<compile_context>
chip_gen: v7x
topology: tpu7x:2x2x1
jax: 0.10.0
libtpu: 0.0.40
codegen_flags: <defaults>
</compile_context>

<pallas_src>
import itertools

import jax
import jax.numpy as jnp
from jax.experimental import pallas as pl
from jax.experimental.pallas import tpu as pltpu

EPSILON = 1e-06
SIGMA_BOOST = 2.0

# ----------------------------- configuration --------------------------------
B = 2                       # batch
H_IN, W_IN = 4, 4           # input spatial dims (in_rank = 2)
IN_FLAT = H_IN * W_IN
OUT = 8                     # out_size = (OUT,)
OUT_SIZE = (OUT,)
IN_RANK = 2
LEARN_COLS = (1, 2)         # learn the two input coordinates; out coord hardwired
R = len(LEARN_COLS)         # rank of learned index tuples
N = 8                       # number of learned tuples emitted by hyper()
CHUNK = 2                   # chunk_size
K = N // CHUNK              # number of chunks
NCORNER = 2 ** R            # floor/ceil corner tuples per learned tuple
L_CHUNK = CHUNK * NCORNER   # corner tuples per chunk
L_TOTAL = K * L_CHUNK       # 32 corner tuples per batch element
W_COLS = IN_RANK + len(OUT_SIZE)
H_TEMP = 8                  # rows of temp_indices (L_TOTAL % H_TEMP == 0)
SUBRANGE = (H_IN, W_IN)     # fullrange[learn_cols]
NPROJ = N * (R + 2)         # width of the hyper() linear projection
NQ = 5                      # fused quantities: mean_h, mean_w, inv_h, inv_w, value
EXP_COLS = NQ * (1 + CHUNK) * L_TOTAL   # expansion-matmul output lanes

# temp_indices: hardwired output coordinate in column 0, learned cols are dummies.
TEMP_INDICES = jnp.stack(
    [jnp.arange(H_TEMP, dtype=jnp.int32) % OUT,
     jnp.zeros(H_TEMP, jnp.int32),
     jnp.zeros(H_TEMP, jnp.int32)], axis=1)                    # (H_TEMP, W_COLS)

FLOOR_MASK = jnp.array(
    [[int(bb) for bb in bools]
     for bools in itertools.product([True, False], repeat=R)], dtype=bool)  # (2^R, R)


# ------------------------------ small helpers --------------------------------
def _sigmoid(x):
    # tanh form: overflow-safe and lands on the EUP slot.
    return 0.5 * (jnp.tanh(0.5 * x) + 1.0)


def _softplus(x):
    # numerically-stable softplus using only exp/log/max/abs (all lower on TPU)
    return jnp.maximum(x, 0.0) + jnp.log(1.0 + jnp.exp(-jnp.abs(x)))


# --------------------- host-side static tables (built once) ------------------
def prepare_hyper_weights(w_h, b_h):
    """Regroup hyper() weights (IN, N*(R+2)) -> fused (IN, 5N), ONCE, host-side.

    Fused lane layout: [mean_h | mean_w | sigma | sigma (again) | value], N each.
    (sigma duplicated so inv_h and inv_w each get their own lane block.)
    """
    jmap = (0, 1, 2, 2, 3)
    w_g = w_h.reshape(IN_FLAT, N, R + 2)
    b_g = b_h.reshape(N, R + 2)
    w_f = jnp.concatenate([w_g[:, :, j] for j in jmap], axis=1)     # (IN, 5N)
    b_f = jnp.concatenate([b_g[:, j] for j in jmap])[None, :]        # (1, 5N)
    return w_f, b_f


def build_static_tables():
    """All static 0/1 / index tables used by the kernel (computed once)."""
    f32 = jnp.float32
    t = jnp.arange(L_TOTAL, dtype=jnp.int32)
    owner = t // NCORNER          # owning learned tuple of corner tuple t
    chunk = t // L_CHUNK          # chunk of corner tuple t
    corner = t % NCORNER          # which floor/ceil corner
    n = jnp.arange(N, dtype=jnp.int32)

    # expansion matrix: one matmul broadcasts all 5 quantities to (owner | mates)
    own_blk = (n[:, None] == owner[None, :]).astype(f32)            # (N, L)
    mate_blks = [(n[:, None] == (chunk * CHUNK + c)[None, :]).astype(f32)
                 for c in range(CHUNK)]
    expand = jnp.zeros((NQ * N, EXP_COLS), f32)
    for q in range(NQ):
        for r, blk in enumerate([own_blk] + mate_blks):
            col0 = (q * (1 + CHUNK) + r) * L_TOTAL
            expand = expand.at[q * N:(q + 1) * N, col0:col0 + L_TOTAL].set(blk)

    # per-chunk segment-sum (block diagonal), driven on the MXU
    csum = (chunk[:, None] == chunk[None, :]).astype(f32)            # (L, L)

    # hardwired output scatter (column 0 of temp_indices, tiled like the module)
    out_idx = jnp.repeat(TEMP_INDICES[:, 0], L_TOTAL // H_TEMP)      # (L,)
    scatter = (out_idx[:, None] == jnp.arange(OUT)[None, :]).astype(f32)

    # strict lower triangle: "an earlier chunk-mate equals me" mask
    tril = (jnp.arange(L_CHUNK)[None, :] < jnp.arange(L_CHUNK)[:, None]).astype(f32)

    # which corners take ceil (per FLOOR_MASK ordering of the module)
    ceil_h = (~FLOOR_MASK[:, 0])[corner].astype(f32)[None, :]        # (1, L)
    ceil_w = (~FLOOR_MASK[:, 1])[corner].astype(f32)[None, :]

    # row-index table for the one-hot gather mask
    gather_rows = jnp.broadcast_to(
        jnp.arange(IN_FLAT, dtype=f32)[:, None], (IN_FLAT, L_TOTAL))

    # activation lane tables for the fused (1, 5N) hyper output
    def blk(vals):
        return jnp.concatenate([jnp.full((N,), v, f32) for v in vals])
    act_tab = jnp.stack([
        blk([H_IN - 1.0, W_IN - 1.0, 0.0, 0.0, 0.0]),   # sigmoid scale (means)
        blk([1.0, 1.0, float(H_IN), float(W_IN), 1.0]),  # sigma dim scale
        blk([0.0, 0.0, 1.0, 1.0, 0.0]),                  # rsqrt mask
        blk([0.0, 0.0, 0.0, 0.0, 1.0]),                  # raw value mask
    ], axis=0)                                           # (4, 5N)

    return (act_tab, expand, csum, scatter, tril, ceil_h, ceil_w, gather_rows)


# ------------------------------ fused kernel ---------------------------------
def _hyperlayer_kernel(x_ref, w_ref, b_ref, bias_ref, act_tab_ref, expand_ref,
                       csum_ref, scatter_ref, tril_ref, ceil_h_ref, ceil_w_ref,
                       gather_rows_ref, y_ref):
    f32 = jnp.float32
    x = x_ref[0]                                                   # (1, IN_FLAT)

    # ---- hyper(): ONE fused MXU matmul (was 4 tiny matmuls) ------------------
    hyp = jnp.dot(x, w_ref[...], preferred_element_type=f32) + b_ref[...]  # (1,5N)

    # ---- split_out(): whole-vector activations gated by static lane tables ---
    s_mean = act_tab_ref[0:1, :]
    s_dim = act_tab_ref[1:2, :]
    m_inv = act_tab_ref[2:3, :]
    m_val = act_tab_ref[3:4, :]
    sig_all = _sigmoid(hyp)                                        # EUP tanh
    sp_all = _softplus(hyp + SIGMA_BOOST) + EPSILON
    inv_all = jax.lax.rsqrt(EPSILON + sp_all * s_dim)              # EUP rsqrt
    act = sig_all * s_mean + inv_all * m_inv + hyp * m_val         # (1, 5N)

    # ---- ONE expansion matmul: owner + chunk-mate broadcast of all 5 ---------
    exp_all = jnp.dot(act, expand_ref[...], preferred_element_type=f32)  # (1, 480)

    def _blk(q, r):   # static lane slice: quantity q, role r (0=owner, 1+c=mate c)
        off = (q * (1 + CHUNK) + r) * L_TOTAL
        return exp_all[:, off:off + L_TOTAL]

    mh = _blk(0, 0)                                                # (1, L) owner mean h
    mw = _blk(1, 0)                                                # (1, L) owner mean w

    # ---- corner expansion (generate_integer_tuples, gadditional=radditional=0)
    # floor via int32 truncation; valid because means are non-negative & small.
    flo_h = mh.astype(jnp.int32).astype(f32)
    flo_w = mw.astype(jnp.int32).astype(f32)
    cei_h = flo_h + jnp.where(mh > flo_h, 1.0, 0.0)
    cei_w = flo_w + jnp.where(mw > flo_w, 1.0, 0.0)
    pt_h = flo_h + ceil_h_ref[...] * (cei_h - flo_h)               # (1, L)
    pt_w = flo_w + ceil_w_ref[...] * (cei_w - flo_w)

    # ---- duplicates(): block-diagonal per chunk (O(K*Lc^2), not O(L^2)) ------
    # NOTE: relies on exact f32 equality of small integer corners.
    tril = tril_ref[...][None, :, :]                               # (1, Lc, Lc)
    keep_parts = []
    for k in range(K):                       # static unroll; use fori at large K
        lo = k * L_CHUNK
        ph = pt_h[:, lo:lo + L_CHUNK]
        pw = pt_w[:, lo:lo + L_CHUNK]
        same = ((ph[:, :, None] == ph[:, None, :]) &
                (pw[:, :, None] == pw[:, None, :]))                # (1, Lc, Lc)
        dup = jnp.sum(jnp.where(same, tril, 0.0), axis=2)          # (1, Lc)
        keep_parts.append(jnp.where(dup > 0.5, 0.0, 1.0))
    keep = jnp.concatenate(keep_parts, axis=1)                     # (1, L)

    # ---- densities + per-chunk normalisation + weighted value reduction ------
    tuple_vals = jnp.zeros((1, L_TOTAL), f32)
    for c in range(CHUNK):                   # static unroll; fori at large CHUNK
        mu_h, mu_w = _blk(0, 1 + c), _blk(1, 1 + c)
        iv_h, iv_w = _blk(2, 1 + c), _blk(3, 1 + c)
        v_c = _blk(4, 1 + c)
        zh = (pt_h - mu_h) * iv_h
        zw = (pt_w - mu_w) * iv_w
        prop = jnp.exp(-0.5 * (zh * zh + zw * zw)) * keep
        denom = jnp.dot(prop, csum_ref[...], preferred_element_type=f32)  # MXU segsum
        prop = prop / (denom + EPSILON)      # exact reciprocal (not the bottleneck)
        tuple_vals = tuple_vals + prop * v_c

    # ---- gather x at learned (h, w) via one-hot contraction on the MXU -------
    in_idx = pt_h * float(W_IN) + pt_w                             # exact small ints
    gmask = jnp.where(gather_rows_ref[...] == in_idx, 1.0, 0.0)    # (IN_FLAT, L)
    gathered = jnp.dot(x, gmask, preferred_element_type=f32)       # (1, L)

    # ---- hardwired scatter-add (static pattern -> plain MXU matmul) + bias ---
    # NOTE: (1, OUT=8) is a lane-sparse store; at realistic OUT pad toward a
    # multiple of 128 / pack batch into sublanes for unmasked vst.
    contrib = tuple_vals * gathered
    y = jnp.dot(contrib, scatter_ref[...], preferred_element_type=f32) + bias_ref[...]
    y_ref[0] = y


# ------------------------------ forward pass ---------------------------------
@jax.jit
def hyperlayer_forward(x, w_f, b_f, bias, statics):
    (act_tab, expand, csum, scatter, tril, ceil_h, ceil_w, gather_rows) = statics
    x3 = x.reshape(B, 1, IN_FLAT)
    const = lambda b: (0, 0)          # static tables: same block every grid step
    y3 = pl.pallas_call(
        _hyperlayer_kernel,
        out_shape=jax.ShapeDtypeStruct((B, 1, OUT), jnp.float32),
        grid=(B,),
        in_specs=[
            pl.BlockSpec((1, 1, IN_FLAT), lambda b: (b, 0, 0)),
            pl.BlockSpec((IN_FLAT, NQ * N), const),
            pl.BlockSpec((1, NQ * N), const),
            pl.BlockSpec((1, OUT), const),
            pl.BlockSpec((4, NQ * N), const),
            pl.BlockSpec((NQ * N, EXP_COLS), const),
            pl.BlockSpec((L_TOTAL, L_TOTAL), const),
            pl.BlockSpec((L_TOTAL, OUT), const),
            pl.BlockSpec((L_CHUNK, L_CHUNK), const),
            pl.BlockSpec((1, L_TOTAL), const),
            pl.BlockSpec((1, L_TOTAL), const),
            pl.BlockSpec((IN_FLAT, L_TOTAL), const),
        ],
        out_specs=pl.BlockSpec((1, 1, OUT), lambda b: (b, 0, 0)),
        compiler_params=pltpu.CompilerParams(
            # Batch is a parallel grid axis (v7x megacore shards it; v5e/v6e
            # just loop).  Footprint here is ~200 KiB; re-derive the limit /
            # tiling against 64 MiB VMEM when scaling up on v7x.
            dimension_semantics=("parallel",),
            vmem_limit_bytes=16 * 1024 * 1024,
        ),
    )(x3, w_f, b_f, bias.reshape(1, OUT), act_tab, expand, csum, scatter,
      tril, ceil_h, ceil_w, gather_rows)
    return y3.reshape(B, OUT)


# --------------------- pure-JAX reference of the same math -------------------
@jax.jit
def _reference_forward(x, w_h, b_h, bias):
    batch = x.shape[0]
    x_flat = x.reshape(batch, -1)
    res = (x_flat @ w_h + b_h).reshape(batch, N, R + 2)
    sm = jnp.array([d - 1.0 for d in SUBRANGE], jnp.float32)
    ss = jnp.array(SUBRANGE, jnp.float32)
    means = _sigmoid(res[:, :, :R]) * sm
    sigmas = (_softplus(res[:, :, R] + SIGMA_BOOST) + EPSILON)[:, :, None] * ss
    values = res[:, :, R + 1]
    means4 = means.reshape(batch, K, CHUNK, R)
    sigmas4 = sigmas.reshape(batch, K, CHUNK, R)
    vals3 = values.reshape(batch, K, CHUNK)
    corners = jnp.where(FLOOR_MASK[None, None, None, :, :],
                        jnp.floor(means4)[:, :, :, None, :],
                        jnp.ceil(means4)[:, :, :, None, :]).astype(jnp.int32)
    idx_int = corners.reshape(batch, K, L_CHUNK, R)
    # duplicates: equal integer tuples, keep the first occurrence in each chunk
    eq = jnp.all(idx_int[:, :, :, None, :] == idx_int[:, :, None, :, :], axis=-1)
    tri = jnp.tril(jnp.ones((L_CHUNK, L_CHUNK), bool), k=-1)
    dup = jnp.any(eq & tri[None, None], axis=-1)
    pts = idx_int.astype(jnp.float32)
    inv = jax.lax.rsqrt(EPSILON + sigmas4)
    diff = (pts[:, :, :, None, :] - means4[:, :, None, :, :]) * inv[:, :, None, :, :]
    num = jnp.exp(-0.5 * jnp.sum(diff * diff, axis=-1))                    # (B,K,l,C)
    props = num * (1.0 - dup.astype(jnp.float32))[:, :, :, None]
    props = props / (jnp.sum(props, axis=2, keepdims=True) + EPSILON)
    tvals = jnp.sum(props * vals3[:, :, None, :], axis=-1).reshape(batch, L_TOTAL)
    learned = idx_int.reshape(batch, L_TOTAL, R)
    template = jnp.broadcast_to(TEMP_INDICES[None, :, None, :],
                                (batch, H_TEMP, L_TOTAL // H_TEMP, W_COLS)
                                ).reshape(batch, L_TOTAL, W_COLS)
    full = template.at[:, :, jnp.array(LEARN_COLS)].set(learned)
    out_i = full[:, :, 0]
    in_i = full[:, :, 1] * x.shape[2] + full[:, :, 2]
    gathered = jnp.take_along_axis(x_flat, in_i, axis=1)
    contrib = tvals * gathered
    y = jax.vmap(lambda o, c: jnp.zeros(OUT, jnp.float32).at[o].add(c))(out_i, contrib)
    return y + bias[None, :]


if __name__ == "__main__":
    key = jax.random.PRNGKey(0)
    kx, kw, kb, kbias = jax.random.split(key, 4)
    x = jax.random.normal(kx, (B, H_IN, W_IN), jnp.float32)
    w_h = 0.5 * jax.random.normal(kw, (IN_FLAT, NPROJ), jnp.float32)
    b_h = 0.1 * jax.random.normal(kb, (NPROJ,), jnp.float32)
    bias = 0.1 * jax.random.normal(kbias, (OUT,), jnp.float32)

    # weight regrouping and static 0/1 tables are built ONCE, outside the
    # jitted per-call forward (per the perf review).
    w_f, b_f = prepare_hyper_weights(w_h, b_h)
    statics = build_static_tables()

    y = jax.block_until_ready(hyperlayer_forward(x, w_f, b_f, bias, statics))
    y_ref = jax.block_until_ready(_reference_forward(x, w_h, b_h, bias))

    assert y.shape == (B, OUT)
    assert jnp.allclose(y, y_ref, rtol=2e-2, atol=2e-2), (y, y_ref)
    print("KERNEL_OK")
</pallas_src>

<mosaic_0001>
module attributes {stable_mosaic.version = 11 : i64} {
  func.func @_hyperlayer_kernel(%arg0: i32, %arg1: memref<1x1x16xf32, #tpu.memory_space<vmem>>, %arg2: memref<16x40xf32, #tpu.memory_space<vmem>>, %arg3: memref<1x40xf32, #tpu.memory_space<vmem>>, %arg4: memref<1x8xf32, #tpu.memory_space<vmem>>, %arg5: memref<4x40xf32, #tpu.memory_space<vmem>>, %arg6: memref<40x480xf32, #tpu.memory_space<vmem>>, %arg7: memref<32x32xf32, #tpu.memory_space<vmem>>, %arg8: memref<32x8xf32, #tpu.memory_space<vmem>>, %arg9: memref<8x8xf32, #tpu.memory_space<vmem>>, %arg10: memref<1x32xf32, #tpu.memory_space<vmem>>, %arg11: memref<1x32xf32, #tpu.memory_space<vmem>>, %arg12: memref<16x32xf32, #tpu.memory_space<vmem>>, %arg13: memref<1x1x8xf32, #tpu.memory_space<vmem>>) attributes {dimension_semantics = [#tpu.dimension_semantics<parallel>], iteration_bounds = array<i64: 2>, scalar_prefetch = 0 : i64, scratch_operands = 0 : i64, tpu.core_type = #tpu.core_type<tc>, window_params = [{transform_indices = @transform_0, window_bounds = array<i64: 1, 1, 16>}, {pipeline_mode = #tpu.pipeline_mode<synchronous>, transform_indices = @transform_1, window_bounds = array<i64: 16, 40>}, {pipeline_mode = #tpu.pipeline_mode<synchronous>, transform_indices = @transform_2, window_bounds = array<i64: 1, 40>}, {pipeline_mode = #tpu.pipeline_mode<synchronous>, transform_indices = @transform_3, window_bounds = array<i64: 1, 8>}, {pipeline_mode = #tpu.pipeline_mode<synchronous>, transform_indices = @transform_4, window_bounds = array<i64: 4, 40>}, {pipeline_mode = #tpu.pipeline_mode<synchronous>, transform_indices = @transform_5, window_bounds = array<i64: 40, 480>}, {pipeline_mode = #tpu.pipeline_mode<synchronous>, transform_indices = @transform_6, window_bounds = array<i64: 32, 32>}, {pipeline_mode = #tpu.pipeline_mode<synchronous>, transform_indices = @transform_7, window_bounds = array<i64: 32, 8>}, {pipeline_mode = #tpu.pipeline_mode<synchronous>, transform_indices = @transform_8, window_bounds = array<i64: 8, 8>}, {pipeline_mode = #tpu.pipeline_mode<synchronous>, transform_indices = @transform_9, window_bounds = array<i64: 1, 32>}, {pipeline_mode = #tpu.pipeline_mode<synchronous>, transform_indices = @transform_10, window_bounds = array<i64: 1, 32>}, {pipeline_mode = #tpu.pipeline_mode<synchronous>, transform_indices = @transform_11, window_bounds = array<i64: 16, 32>}, {transform_indices = @transform_12, window_bounds = array<i64: 1, 1, 8>}]} {
    %c0 = arith.constant 0 : index
    %c0_0 = arith.constant 0 : index
    %c0_1 = arith.constant 0 : index
    %0 = vector.load %arg1[%c0, %c0_0, %c0_1] : memref<1x1x16xf32, #tpu.memory_space<vmem>>, vector<1x1x16xf32>
    %1 = vector.shape_cast %0 : vector<1x1x16xf32> to vector<1x16xf32>
    %c0_2 = arith.constant 0 : index
    %c0_3 = arith.constant 0 : index
    %2 = vector.load %arg2[%c0_2, %c0_3] : memref<16x40xf32, #tpu.memory_space<vmem>>, vector<16x40xf32>
    %cst = arith.constant dense<0.000000e+00> : vector<1x40xf32>
    %3 = tpu.matmul %1, %2, %cst {dimension_numbers = #tpu.dot_dimension_numbers<[1], [0], [0], [1], [0, 0, 1, 1], [], []>} : vector<1x16xf32>, vector<16x40xf32>, vector<1x40xf32> -> vector<1x40xf32>
    %c0_4 = arith.constant 0 : index
    %c0_5 = arith.constant 0 : index
    %4 = vector.load %arg3[%c0_4, %c0_5] : memref<1x40xf32, #tpu.memory_space<vmem>>, vector<1x40xf32>
    %5 = arith.addf %3, %4 : vector<1x40xf32>
    %c0_6 = arith.constant 0 : index
    %c0_7 = arith.constant 0 : index
    %6 = vector.load %arg5[%c0_6, %c0_7] : memref<4x40xf32, #tpu.memory_space<vmem>>, vector<1x40xf32>
    %c1 = arith.constant 1 : index
    %c0_8 = arith.constant 0 : index
    %7 = vector.load %arg5[%c1, %c0_8] : memref<4x40xf32, #tpu.memory_space<vmem>>, vector<1x40xf32>
    %c2 = arith.constant 2 : index
    %c0_9 = arith.constant 0 : index
    %8 = vector.load %arg5[%c2, %c0_9] : memref<4x40xf32, #tpu.memory_space<vmem>>, vector<1x40xf32>
    %c3 = arith.constant 3 : index
    %c0_10 = arith.constant 0 : index
    %9 = vector.load %arg5[%c3, %c0_10] : memref<4x40xf32, #tpu.memory_space<vmem>>, vector<1x40xf32>
    %cst_11 = arith.constant 5.000000e-01 : f32
    %10 = vector.broadcast %cst_11 : f32 to vector<1x40xf32>
    %11 = arith.mulf %10, %5 : vector<1x40xf32>
    %12 = math.tanh %11 : vector<1x40xf32>
    %cst_12 = arith.constant 1.000000e+00 : f32
    %13 = vector.broadcast %cst_12 : f32 to vector<1x40xf32>
    %14 = arith.addf %12, %13 : vector<1x40xf32>
    %cst_13 = arith.constant 5.000000e-01 : f32
    %15 = vector.broadcast %cst_13 : f32 to vector<1x40xf32>
    %16 = arith.mulf %15, %14 : vector<1x40xf32>
    %cst_14 = arith.constant 2.000000e+00 : f32
    %17 = vector.broadcast %cst_14 : f32 to vector<1x40xf32>
    %18 = arith.addf %5, %17 : vector<1x40xf32>
    %cst_15 = arith.constant 0.000000e+00 : f32
    %19 = vector.broadcast %cst_15 : f32 to vector<1x40xf32>
    %20 = arith.maximumf %18, %19 : vector<1x40xf32>
    %21 = math.absf %18 : vector<1x40xf32>
    %cst_16 = arith.constant 0.000000e+00 : f32
    %22 = vector.broadcast %cst_16 : f32 to vector<1x40xf32>
    %23 = arith.subf %22, %21 : vector<1x40xf32>
    %24 = math.exp %23 : vector<1x40xf32>
    %cst_17 = arith.constant 1.000000e+00 : f32
    %25 = vector.broadcast %cst_17 : f32 to vector<1x40xf32>
    %26 = arith.addf %25, %24 : vector<1x40xf32>
    %27 = math.log %26 : vector<1x40xf32>
    %28 = arith.addf %20, %27 : vector<1x40xf32>
    %cst_18 = arith.constant 9.99999997E-7 : f32
    %29 = vector.broadcast %cst_18 : f32 to vector<1x40xf32>
    %30 = arith.addf %28, %29 : vector<1x40xf32>
    %31 = arith.mulf %30, %7 : vector<1x40xf32>
    %cst_19 = arith.constant 9.99999997E-7 : f32
    %32 = vector.broadcast %cst_19 : f32 to vector<1x40xf32>
    %33 = arith.addf %32, %31 : vector<1x40xf32>
    %34 = math.rsqrt %33 : vector<1x40xf32>
    %35 = arith.mulf %16, %6 : vector<1x40xf32>
    %36 = arith.mulf %34, %8 : vector<1x40xf32>
    %37 = arith.addf %35, %36 : vector<1x40xf32>
    %38 = arith.mulf %5, %9 : vector<1x40xf32>
    %39 = arith.addf %37, %38 : vector<1x40xf32>
    %c0_20 = arith.constant 0 : index
    %c0_21 = arith.constant 0 : index
    %40 = vector.load %arg6[%c0_20, %c0_21] : memref<40x480xf32, #tpu.memory_space<vmem>>, vector<40x480xf32>
    %cst_22 = arith.constant dense<0.000000e+00> : vector<1x480xf32>
    %41 = tpu.matmul %39, %40, %cst_22 {dimension_numbers = #tpu.dot_dimension_numbers<[1], [0], [0], [1], [0, 0, 1, 1], [], []>} : vector<1x40xf32>, vector<40x480xf32>, vector<1x480xf32> -> vector<1x480xf32>
    %42 = vector.extract_strided_slice %41 {offsets = [0, 0], sizes = [1, 32], strides = [1, 1]} : vector<1x480xf32> to vector<1x32xf32>
    %43 = vector.extract_strided_slice %41 {offsets = [0, 96], sizes = [1, 32], strides = [1, 1]} : vector<1x480xf32> to vector<1x32xf32>
    %44 = arith.fptosi %42 : vector<1x32xf32> to vector<1x32xi32>
    %45 = arith.sitofp %44 : vector<1x32xi32> to vector<1x32xf32>
    %46 = arith.fptosi %43 : vector<1x32xf32> to vector<1x32xi32>
    %47 = arith.sitofp %46 : vector<1x32xi32> to vector<1x32xf32>
    %48 = arith.cmpf ogt, %42, %45 : vector<1x32xf32>
    %cst_23 = arith.constant 1.000000e+00 : f32
    %cst_24 = arith.constant 0.000000e+00 : f32
    %49 = vector.broadcast %cst_23 : f32 to vector<1x32xf32>
    %50 = vector.broadcast %cst_24 : f32 to vector<1x32xf32>
    %51 = arith.select %48, %49, %50 : vector<1x32xi1>, vector<1x32xf32>
    %52 = arith.addf %45, %51 : vector<1x32xf32>
    %53 = arith.cmpf ogt, %43, %47 : vector<1x32xf32>
    %cst_25 = arith.constant 1.000000e+00 : f32
    %cst_26 = arith.constant 0.000000e+00 : f32
    %54 = vector.broadcast %cst_25 : f32 to vector<1x32xf32>
    %55 = vector.broadcast %cst_26 : f32 to vector<1x32xf32>
    %56 = arith.select %53, %54, %55 : vector<1x32xi1>, vector<1x32xf32>
    %57 = arith.addf %47, %56 : vector<1x32xf32>
    %c0_27 = arith.constant 0 : index
    %c0_28 = arith.constant 0 : index
    %58 = vector.load %arg10[%c0_27, %c0_28] : memref<1x32xf32, #tpu.memory_space<vmem>>, vector<1x32xf32>
    %59 = arith.subf %52, %45 : vector<1x32xf32>
    %60 = arith.mulf %58, %59 : vector<1x32xf32>
    %61 = arith.addf %45, %60 : vector<1x32xf32>
    %c0_29 = arith.constant 0 : index
    %c0_30 = arith.constant 0 : index
    %62 = vector.load %arg11[%c0_29, %c0_30] : memref<1x32xf32, #tpu.memory_space<vmem>>, vector<1x32xf32>
    %63 = arith.subf %57, %47 : vector<1x32xf32>
    %64 = arith.mulf %62, %63 : vector<1x32xf32>
    %65 = arith.addf %47, %64 : vector<1x32xf32>
    %c0_31 = arith.constant 0 : index
    %c0_32 = arith.constant 0 : index
    %66 = vector.load %arg9[%c0_31, %c0_32] : memref<8x8xf32, #tpu.memory_space<vmem>>, vector<8x8xf32>
    %67 = vector.shape_cast %66 : vector<8x8xf32> to vector<1x8x8xf32>
    %68 = vector.extract_strided_slice %61 {offsets = [0, 0], sizes = [1, 8], strides = [1, 1]} : vector<1x32xf32> to vector<1x8xf32>
    %69 = vector.extract_strided_slice %65 {offsets = [0, 0], sizes = [1, 8], strides = [1, 1]} : vector<1x32xf32> to vector<1x8xf32>
    %70 = vector.shape_cast %68 : vector<1x8xf32> to vector<1x8x1xf32>
    %71 = vector.shape_cast %68 : vector<1x8xf32> to vector<1x1x8xf32>
    %72 = vector.broadcast %70 : vector<1x8x1xf32> to vector<1x8x8xf32>
    %73 = vector.broadcast %71 : vector<1x1x8xf32> to vector<1x8x8xf32>
    %74 = arith.cmpf oeq, %72, %73 : vector<1x8x8xf32>
    %75 = vector.shape_cast %69 : vector<1x8xf32> to vector<1x8x1xf32>
    %76 = vector.shape_cast %69 : vector<1x8xf32> to vector<1x1x8xf32>
    %77 = vector.broadcast %75 : vector<1x8x1xf32> to vector<1x8x8xf32>
    %78 = vector.broadcast %76 : vector<1x1x8xf32> to vector<1x8x8xf32>
    %79 = arith.cmpf oeq, %77, %78 : vector<1x8x8xf32>
    %80 = arith.andi %74, %79 : vector<1x8x8xi1>
    %cst_33 = arith.constant 0.000000e+00 : f32
    %81 = vector.broadcast %cst_33 : f32 to vector<1x8x8xf32>
    %82 = arith.select %80, %67, %81 : vector<1x8x8xi1>, vector<1x8x8xf32>
    %cst_34 = arith.constant dense<0.000000e+00> : vector<1x8xf32>
    %83 = vector.multi_reduction <add>, %82, %cst_34 [2] : vector<1x8x8xf32> to vector<1x8xf32>
    %cst_35 = arith.constant 5.000000e-01 : f32
    %84 = vector.broadcast %cst_35 : f32 to vector<1x8xf32>
    %85 = arith.cmpf ogt, %83, %84 : vector<1x8xf32>
    %cst_36 = arith.constant 0.000000e+00 : f32
    %cst_37 = arith.constant 1.000000e+00 : f32
    %86 = vector.broadcast %cst_36 : f32 to vector<1x8xf32>
    %87 = vector.broadcast %cst_37 : f32 to vector<1x8xf32>
    %88 = arith.select %85, %86, %87 : vector<1x8xi1>, vector<1x8xf32>
    %89 = vector.extract_strided_slice %61 {offsets = [0, 8], sizes = [1, 8], strides = [1, 1]} : vector<1x32xf32> to vector<1x8xf32>
    %90 = vector.extract_strided_slice %65 {offsets = [0, 8], sizes = [1, 8], strides = [1, 1]} : vector<1x32xf32> to vector<1x8xf32>
    %91 = vector.shape_cast %89 : vector<1x8xf32> to vector<1x8x1xf32>
    %92 = vector.shape_cast %89 : vector<1x8xf32> to vector<1x1x8xf32>
    %93 = vector.broadcast %91 : vector<1x8x1xf32> to vector<1x8x8xf32>
    %94 = vector.broadcast %92 : vector<1x1x8xf32> to vector<1x8x8xf32>
    %95 = arith.cmpf oeq, %93, %94 : vector<1x8x8xf32>
    %96 = vector.shape_cast %90 : vector<1x8xf32> to vector<1x8x1xf32>
    %97 = vector.shape_cast %90 : vector<1x8xf32> to vector<1x1x8xf32>
    %98 = vector.broadcast %96 : vector<1x8x1xf32> to vector<1x8x8xf32>
    %99 = vector.broadcast %97 : vector<1x1x8xf32> to vector<1x8x8xf32>
    %100 = arith.cmpf oeq, %98, %99 : vector<1x8x8xf32>
    %101 = arith.andi %95, %100 : vector<1x8x8xi1>
    %cst_38 = arith.constant 0.000000e+00 : f32
    %102 = vector.broadcast %cst_38 : f32 to vector<1x8x8xf32>
    %103 = arith.select %101, %67, %102 : vector<1x8x8xi1>, vector<1x8x8xf32>
    %cst_39 = arith.constant dense<0.000000e+00> : vector<1x8xf32>
    %104 = vector.multi_reduction <add>, %103, %cst_39 [2] : vector<1x8x8xf32> to vector<1x8xf32>
    %cst_40 = arith.constant 5.000000e-01 : f32
    %105 = vector.broadcast %cst_40 : f32 to vector<1x8xf32>
    %106 = arith.cmpf ogt, %104, %105 : vector<1x8xf32>
    %cst_41 = arith.constant 0.000000e+00 : f32
    %cst_42 = arith.constant 1.000000e+00 : f32
    %107 = vector.broadcast %cst_41 : f32 to vector<1x8xf32>
    %108 = vector.broadcast %cst_42 : f32 to vector<1x8xf32>
    %109 = arith.select %106, %107, %108 : vector<1x8xi1>, vector<1x8xf32>
    %110 = vector.extract_strided_slice %61 {offsets = [0, 16], sizes = [1, 8], strides = [1, 1]} : vector<1x32xf32> to vector<1x8xf32>
    %111 = vector.extract_strided_slice %65 {offsets = [0, 16], sizes = [1, 8], strides = [1, 1]} : vector<1x32xf32> to vector<1x8xf32>
    %112 = vector.shape_cast %110 : vector<1x8xf32> to vector<1x8x1xf32>
    %113 = vector.shape_cast %110 : vector<1x8xf32> to vector<1x1x8xf32>
    %114 = vector.broadcast %112 : vector<1x8x1xf32> to vector<1x8x8xf32>
    %115 = vector.broadcast %113 : vector<1x1x8xf32> to vector<1x8x8xf32>
    %116 = arith.cmpf oeq, %114, %115 : vector<1x8x8xf32>
    %117 = vector.shape_cast %111 : vector<1x8xf32> to vector<1x8x1xf32>
    %118 = vector.shape_cast %111 : vector<1x8xf32> to vector<1x1x8xf32>
    %119 = vector.broadcast %117 : vector<1x8x1xf32> to vector<1x8x8xf32>
    %120 = vector.broadcast %118 : vector<1x1x8xf32> to vector<1x8x8xf32>
    %121 = arith.cmpf oeq, %119, %120 : vector<1x8x8xf32>
    %122 = arith.andi %116, %121 : vector<1x8x8xi1>
    %cst_43 = arith.constant 0.000000e+00 : f32
    %123 = vector.broadcast %cst_43 : f32 to vector<1x8x8xf32>
    %124 = arith.select %122, %67, %123 : vector<1x8x8xi1>, vector<1x8x8xf32>
    %cst_44 = arith.constant dense<0.000000e+00> : vector<1x8xf32>
    %125 = vector.multi_reduction <add>, %124, %cst_44 [2] : vector<1x8x8xf32> to vector<1x8xf32>
    %cst_45 = arith.constant 5.000000e-01 : f32
    %126 = vector.broadcast %cst_45 : f32 to vector<1x8xf32>
    %127 = arith.cmpf ogt, %125, %126 : vector<1x8xf32>
    %cst_46 = arith.constant 0.000000e+00 : f32
    %cst_47 = arith.constant 1.000000e+00 : f32
    %128 = vector.broadcast %cst_46 : f32 to vector<1x8xf32>
    %129 = vector.broadcast %cst_47 : f32 to vector<1x8xf32>
    %130 = arith.select %127, %128, %129 : vector<1x8xi1>, vector<1x8xf32>
    %131 = vector.extract_strided_slice %61 {offsets = [0, 24], sizes = [1, 8], strides = [1, 1]} : vector<1x32xf32> to vector<1x8xf32>
    %132 = vector.extract_strided_slice %65 {offsets = [0, 24], sizes = [1, 8], strides = [1, 1]} : vector<1x32xf32> to vector<1x8xf32>
    %133 = vector.shape_cast %131 : vector<1x8xf32> to vector<1x8x1xf32>
    %134 = vector.shape_cast %131 : vector<1x8xf32> to vector<1x1x8xf32>
    %135 = vector.broadcast %133 : vector<1x8x1xf32> to vector<1x8x8xf32>
    %136 = vector.broadcast %134 : vector<1x1x8xf32> to vector<1x8x8xf32>
    %137 = arith.cmpf oeq, %135, %136 : vector<1x8x8xf32>
    %138 = vector.shape_cast %132 : vector<1x8xf32> to vector<1x8x1xf32>
    %139 = vector.shape_cast %132 : vector<1x8xf32> to vector<1x1x8xf32>
    %140 = vector.broadcast %138 : vector<1x8x1xf32> to vector<1x8x8xf32>
    %141 = vector.broadcast %139 : vector<1x1x8xf32> to vector<1x8x8xf32>
    %142 = arith.cmpf oeq, %140, %141 : vector<1x8x8xf32>
    %143 = arith.andi %137, %142 : vector<1x8x8xi1>
    %cst_48 = arith.constant 0.000000e+00 : f32
    %144 = vector.broadcast %cst_48 : f32 to vector<1x8x8xf32>
    %145 = arith.select %143, %67, %144 : vector<1x8x8xi1>, vector<1x8x8xf32>
    %cst_49 = arith.constant dense<0.000000e+00> : vector<1x8xf32>
    %146 = vector.multi_reduction <add>, %145, %cst_49 [2] : vector<1x8x8xf32> to vector<1x8xf32>
    %cst_50 = arith.constant 5.000000e-01 : f32
    %147 = vector.broadcast %cst_50 : f32 to vector<1x8xf32>
    %148 = arith.cmpf ogt, %146, %147 : vector<1x8xf32>
    %cst_51 = arith.constant 0.000000e+00 : f32
    %cst_52 = arith.constant 1.000000e+00 : f32
    %149 = vector.broadcast %cst_51 : f32 to vector<1x8xf32>
    %150 = vector.broadcast %cst_52 : f32 to vector<1x8xf32>
    %151 = arith.select %148, %149, %150 : vector<1x8xi1>, vector<1x8xf32>
    %152 = tpu.concatenate %88, %109, %130, %151 in 1 : vector<1x8xf32>, vector<1x8xf32>, vector<1x8xf32>, vector<1x8xf32> -> vector<1x32xf32>
    %cst_53 = arith.constant 0.000000e+00 : f32
    %153 = vector.broadcast %cst_53 : f32 to vector<1x32xf32>
    %154 = vector.extract_strided_slice %41 {offsets = [0, 32], sizes = [1, 32], strides = [1, 1]} : vector<1x480xf32> to vector<1x32xf32>
    %155 = vector.extract_strided_slice %41 {offsets = [0, 128], sizes = [1, 32], strides = [1, 1]} : vector<1x480xf32> to vector<1x32xf32>
    %156 = vector.extract_strided_slice %41 {offsets = [0, 224], sizes = [1, 32], strides = [1, 1]} : vector<1x480xf32> to vector<1x32xf32>
    %157 = vector.extract_strided_slice %41 {offsets = [0, 320], sizes = [1, 32], strides = [1, 1]} : vector<1x480xf32> to vector<1x32xf32>
    %158 = vector.extract_strided_slice %41 {offsets = [0, 416], sizes = [1, 32], strides = [1, 1]} : vector<1x480xf32> to vector<1x32xf32>
    %159 = arith.subf %61, %154 : vector<1x32xf32>
    %160 = arith.mulf %159, %156 : vector<1x32xf32>
    %161 = arith.subf %65, %155 : vector<1x32xf32>
    %162 = arith.mulf %161, %157 : vector<1x32xf32>
    %163 = arith.mulf %160, %160 : vector<1x32xf32>
    %164 = arith.mulf %162, %162 : vector<1x32xf32>
    %165 = arith.addf %163, %164 : vector<1x32xf32>
    %cst_54 = arith.constant -5.000000e-01 : f32
    %166 = vector.broadcast %cst_54 : f32 to vector<1x32xf32>
    %167 = arith.mulf %166, %165 : vector<1x32xf32>
    %168 = math.exp %167 : vector<1x32xf32>
    %169 = arith.mulf %168, %152 : vector<1x32xf32>
    %c0_55 = arith.constant 0 : index
    %c0_56 = arith.constant 0 : index
    %170 = vector.load %arg7[%c0_55, %c0_56] : memref<32x32xf32, #tpu.memory_space<vmem>>, vector<32x32xf32>
    %cst_57 = arith.constant dense<0.000000e+00> : vector<1x32xf32>
    %171 = tpu.matmul %169, %170, %cst_57 {dimension_numbers = #tpu.dot_dimension_numbers<[1], [0], [0], [1], [0, 0, 1, 1], [], []>} : vector<1x32xf32>, vector<32x32xf32>, vector<1x32xf32> -> vector<1x32xf32>
    %cst_58 = arith.constant 9.99999997E-7 : f32
    %172 = vector.broadcast %cst_58 : f32 to vector<1x32xf32>
    %173 = arith.addf %171, %172 : vector<1x32xf32>
    %174 = arith.divf %169, %173 : vector<1x32xf32>
    %175 = arith.mulf %174, %158 : vector<1x32xf32>
    %176 = arith.addf %153, %175 : vector<1x32xf32>
    %177 = vector.extract_strided_slice %41 {offsets = [0, 64], sizes = [1, 32], strides = [1, 1]} : vector<1x480xf32> to vector<1x32xf32>
    %178 = vector.extract_strided_slice %41 {offsets = [0, 160], sizes = [1, 32], strides = [1, 1]} : vector<1x480xf32> to vector<1x32xf32>
    %179 = vector.extract_strided_slice %41 {offsets = [0, 256], sizes = [1, 32], strides = [1, 1]} : vector<1x480xf32> to vector<1x32xf32>
    %180 = vector.extract_strided_slice %41 {offsets = [0, 352], sizes = [1, 32], strides = [1, 1]} : vector<1x480xf32> to vector<1x32xf32>
    %181 = vector.extract_strided_slice %41 {offsets = [0, 448], sizes = [1, 32], strides = [1, 1]} : vector<1x480xf32> to vector<1x32xf32>
    %182 = arith.subf %61, %177 : vector<1x32xf32>
    %183 = arith.mulf %182, %179 : vector<1x32xf32>
    %184 = arith.subf %65, %178 : vector<1x32xf32>
    %185 = arith.mulf %184, %180 : vector<1x32xf32>
    %186 = arith.mulf %183, %183 : vector<1x32xf32>
    %187 = arith.mulf %185, %185 : vector<1x32xf32>
    %188 = arith.addf %186, %187 : vector<1x32xf32>
    %cst_59 = arith.constant -5.000000e-01 : f32
    %189 = vector.broadcast %cst_59 : f32 to vector<1x32xf32>
    %190 = arith.mulf %189, %188 : vector<1x32xf32>
    %191 = math.exp %190 : vector<1x32xf32>
    %192 = arith.mulf %191, %152 : vector<1x32xf32>
    %c0_60 = arith.constant 0 : index
    %c0_61 = arith.constant 0 : index
    %193 = vector.load %arg7[%c0_60, %c0_61] : memref<32x32xf32, #tpu.memory_space<vmem>>, vector<32x32xf32>
    %cst_62 = arith.constant dense<0.000000e+00> : vector<1x32xf32>
    %194 = tpu.matmul %192, %193, %cst_62 {dimension_numbers = #tpu.dot_dimension_numbers<[1], [0], [0], [1], [0, 0, 1, 1], [], []>} : vector<1x32xf32>, vector<32x32xf32>, vector<1x32xf32> -> vector<1x32xf32>
    %cst_63 = arith.constant 9.99999997E-7 : f32
    %195 = vector.broadcast %cst_63 : f32 to vector<1x32xf32>
    %196 = arith.addf %194, %195 : vector<1x32xf32>
    %197 = arith.divf %192, %196 : vector<1x32xf32>
    %198 = arith.mulf %197, %181 : vector<1x32xf32>
    %199 = arith.addf %176, %198 : vector<1x32xf32>
    %cst_64 = arith.constant 4.000000e+00 : f32
    %200 = vector.broadcast %cst_64 : f32 to vector<1x32xf32>
    %201 = arith.mulf %61, %200 : vector<1x32xf32>
    %202 = arith.addf %201, %65 : vector<1x32xf32>
    %c0_65 = arith.constant 0 : index
    %c0_66 = arith.constant 0 : index
    %203 = vector.load %arg12[%c0_65, %c0_66] : memref<16x32xf32, #tpu.memory_space<vmem>>, vector<16x32xf32>
    %204 = vector.broadcast %202 : vector<1x32xf32> to vector<16x32xf32>
    %205 = arith.cmpf oeq, %203, %204 : vector<16x32xf32>
    %cst_67 = arith.constant 1.000000e+00 : f32
    %cst_68 = arith.constant 0.000000e+00 : f32
    %206 = vector.broadcast %cst_67 : f32 to vector<16x32xf32>
    %207 = vector.broadcast %cst_68 : f32 to vector<16x32xf32>
    %208 = arith.select %205, %206, %207 : vector<16x32xi1>, vector<16x32xf32>
    %cst_69 = arith.constant dense<0.000000e+00> : vector<1x32xf32>
    %209 = tpu.matmul %1, %208, %cst_69 {dimension_numbers = #tpu.dot_dimension_numbers<[1], [0], [0], [1], [0, 0, 1, 1], [], []>} : vector<1x16xf32>, vector<16x32xf32>, vector<1x32xf32> -> vector<1x32xf32>
    %210 = arith.mulf %199, %209 : vector<1x32xf32>
    %c0_70 = arith.constant 0 : index
    %c0_71 = arith.constant 0 : index
    %211 = vector.load %arg8[%c0_70, %c0_71] : memref<32x8xf32, #tpu.memory_space<vmem>>, vector<32x8xf32>
    %cst_72 = arith.constant dense<0.000000e+00> : vector<1x8xf32>
    %212 = tpu.matmul %210, %211, %cst_72 {dimension_numbers = #tpu.dot_dimension_numbers<[1], [0], [0], [1], [0, 0, 1, 1], [], []>} : vector<1x32xf32>, vector<32x8xf32>, vector<1x8xf32> -> vector<1x8xf32>
    %c0_73 = arith.constant 0 : index
    %c0_74 = arith.constant 0 : index
    %213 = vector.load %arg4[%c0_73, %c0_74] : memref<1x8xf32, #tpu.memory_space<vmem>>, vector<1x8xf32>
    %214 = arith.addf %212, %213 : vector<1x8xf32>
    %c0_75 = arith.constant 0 : index
    %c0_76 = arith.constant 0 : index
    %c0_77 = arith.constant 0 : index
    %215 = vector.load %arg13[%c0_75, %c0_76, %c0_77] : memref<1x1x8xf32, #tpu.memory_space<vmem>>, vector<1x1x8xf32>
    %216 = vector.shape_cast %215 : vector<1x1x8xf32> to vector<1x8xf32>
    %217 = vector.shape_cast %214 : vector<1x8xf32> to vector<1x1x8xf32>
    tpu.vector_store %arg13[%c0_75, %c0_76, %c0_77], %217 {strides = array<i32>} : memref<1x1x8xf32, #tpu.memory_space<vmem>>, vector<1x1x8xf32>,
    return
  }
  func.func @transform_0(%arg0: i32) -> (i32, i32, i32) {
    %c0_i32 = arith.constant 0 : i32
    %c0_i32_0 = arith.constant 0 : i32
    %c0_i32_1 = arith.constant 0 : i32
    return %arg0, %c0_i32, %c0_i32_0 : i32, i32, i32
  }
  func.func @transform_1(%arg0: i32) -> (i32, i32) {
    %c0_i32 = arith.constant 0 : i32
    %c0_i32_0 = arith.constant 0 : i32
    %c0_i32_1 = arith.constant 0 : i32
    return %c0_i32, %c0_i32_0 : i32, i32
  }
  func.func @transform_2(%arg0: i32) -> (i32, i32) {
    %c0_i32 = arith.constant 0 : i32
    %c0_i32_0 = arith.constant 0 : i32
    %c0_i32_1 = arith.constant 0 : i32
    return %c0_i32, %c0_i32_0 : i32, i32
  }
  func.func @transform_3(%arg0: i32) -> (i32, i32) {
    %c0_i32 = arith.constant 0 : i32
    %c0_i32_0 = arith.constant 0 : i32
    %c0_i32_1 = arith.constant 0 : i32
    return %c0_i32, %c0_i32_0 : i32, i32
  }
  func.func @transform_4(%arg0: i32) -> (i32, i32) {
    %c0_i32 = arith.constant 0 : i32
    %c0_i32_0 = arith.constant 0 : i32
    %c0_i32_1 = arith.constant 0 : i32
    return %c0_i32, %c0_i32_0 : i32, i32
  }
  func.func @transform_5(%arg0: i32) -> (i32, i32) {
    %c0_i32 = arith.constant 0 : i32
    %c0_i32_0 = arith.constant 0 : i32
    %c0_i32_1 = arith.constant 0 : i32
    return %c0_i32, %c0_i32_0 : i32, i32
  }
  func.func @transform_6(%arg0: i32) -> (i32, i32) {
    %c0_i32 = arith.constant 0 : i32
    %c0_i32_0 = arith.constant 0 : i32
    %c0_i32_1 = arith.constant 0 : i32
    return %c0_i32, %c0_i32_0 : i32, i32
  }
  func.func @transform_7(%arg0: i32) -> (i32, i32) {
    %c0_i32 = arith.constant 0 : i32
    %c0_i32_0 = arith.constant 0 : i32
    %c0_i32_1 = arith.constant 0 : i32
    return %c0_i32, %c0_i32_0 : i32, i32
  }
  func.func @transform_8(%arg0: i32) -> (i32, i32) {
    %c0_i32 = arith.constant 0 : i32
    %c0_i32_0 = arith.constant 0 : i32
    %c0_i32_1 = arith.constant 0 : i32
    return %c0_i32, %c0_i32_0 : i32, i32
  }
  func.func @transform_9(%arg0: i32) -> (i32, i32) {
    %c0_i32 = arith.constant 0 : i32
    %c0_i32_0 = arith.constant 0 : i32
    %c0_i32_1 = arith.constant 0 : i32
    return %c0_i32, %c0_i32_0 : i32, i32
  }
  func.func @transform_10(%arg0: i32) -> (i32, i32) {
    %c0_i32 = arith.constant 0 : i32
    %c0_i32_0 = arith.constant 0 : i32
    %c0_i32_1 = arith.constant 0 : i32
    return %c0_i32, %c0_i32_0 : i32, i32
  }
  func.func @transform_11(%arg0: i32) -> (i32, i32) {
    %c0_i32 = arith.constant 0 : i32
    %c0_i32_0 = arith.constant 0 : i32
    %c0_i32_1 = arith.constant 0 : i32
    return %c0_i32, %c0_i32_0 : i32, i32
  }
  func.func @transform_12(%arg0: i32) -> (i32, i32, i32) {
    %c0_i32 = arith.constant 0 : i32
    %c0_i32_0 = arith.constant 0 : i32
    %c0_i32_1 = arith.constant 0 : i32
    return %arg0, %c0_i32, %c0_i32_0 : i32, i32, i32
  }
}

</mosaic_0001>

<bundles_post_ra>
// kernel: hyperlayer_forward.1
= control target key start
LH: loop header
LB: loop body
LE: loop exit
PB: predicated region body
PF: predicated region fallthrough
CT: control target
= control target key end

     0   :  { %17 = vsyncpa [#allocation3], 0  ;;  %s2311_s0 = inlined_call_operand.vmem [shape: f32[2,1,16], index: 0, kind: input, shape index: {}]   ;;  %s2312_s1 = inlined_call_operand.vmem [shape: f32[16,40], index: 1, kind: input, shape index: {}]   ;;  %s2313_s2 = inlined_call_operand.hbm [shape: f32[1,40], index: 2, kind: input, shape index: {}]   ;;  %s2314_s3 = inlined_call_operand.hbm [shape: f32[1,8], index: 3, kind: input, shape index: {}]   ;;  %s2315_s4 = inlined_call_operand.hbm [shape: f32[4,40], index: 4, kind: input, shape index: {}]   ;;  %s2316_s5 = inlined_call_operand.hbm [shape: f32[40,480], index: 5, kind: input, shape index: {}]   ;;  %s2317_s6 = inlined_call_operand.vmem [shape: f32[32,32], index: 6, kind: input, shape index: {}]   ;;  %s2318_s7 = inlined_call_operand.vmem [shape: f32[32,8], index: 7, kind: input, shape index: {}]   ;;  %s2319_s8 = inlined_call_operand.vmem [shape: f32[8,8], index: 8, kind: input, shape index: {}]   ;;  %s2320_s9 = inlined_call_operand.vmem [shape: f32[1,32], index: 9, kind: input, shape index: {}]   ;;  %s2321_s10 = inlined_call_operand.vmem [shape: f32[1,32], index: 10, kind: input, shape index: {}]   ;;  %s2322_s11 = inlined_call_operand.vmem [shape: f32[16,32], index: 11, kind: input, shape index: {}]   ;;  %s2323_s12 = inlined_call_operand.hbm [shape: f32[2,1,8], index: 12, kind: output, shape index: {}]  }
   0x1   :  { %18 = vsyncpa [#allocation6], 0 }
   0x2   :  { %19 = vsyncpa [#allocation9], 0 }
   0x3   :  { %20 = vsyncpa [#allocation4], 0 }
   0x4   :  { %22 = vsyncpa [#allocation4 + $0x1], 0  ;;  %s1929_s21 = smov 0   ;;  %s1931_s22 = smov 0  }
   0x5   :  { %s1933_s23 = smov 0   ;;  %s1935_s24 = smov 0  }
   0x6 LB: > { %2333 = sst [smem:[#allocation15_spill]] %s1827_s21  ;;  %s1950_s25 = sadd.s32 4294967295, %s1839_s24   ;;  %s1839_s24 = sphi %s1935_s24, %s2356_s24   ;;  %s1835_s23 = sphi %s1933_s23, %s2361_s23   ;;  %s1831_s22 = sphi %s1931_s22, %s2360_s22   ;;  %s1827_s21 = sphi %s1929_s21, %s2359_s21  }
   0x7   : > { %2334 = sst [smem:[#allocation16_spill]] %s1835_s23  ;;  %s1405_s26 = sadd.s32 4294967294, %s1839_s24  }
   0x8   : > { %2335 = sst [smem:[#allocation17_spill]] %s1839_s24  ;;  %s1954_s27 = sadd.s32 1, %s1839_s24  }
   0x9   : > { %2336 = sst [smem:[#allocation18_spill]] %s1954_s27  ;;  %s292_s28 = sadd.s32 1, %s1835_s23 }
   0xa   : > { %s289_s29 = ssub.s32 %s1839_s24, %s1954_s27  ;;  %p302_p0 = scmp.ne.s32.totalorder %s1835_s23, %s1831_s22 }
   0xb   : > { %p290_p1 = scmp.eq.s32.totalorder %s289_s29, 0  ;;  %p303_p2 = scmp.eq.s32.totalorder %s1950_s25, 1 }
   0xc   : > { %p308_p3 = scmp.ne.s32.totalorder %s1831_s22, %s1827_s21  ;;  %p309_p4 = scmp.eq.s32.totalorder %s1405_s26, 1 }
   0xd   : > { %s1965_s30 = scalar_select %p290_p1, %s1835_s23, %s292_s28  }
   0xe   : > { %p1967_p5 = por %p303_p2, %p302_p0  ;;  %p1971_p6 = por %p309_p4, %p308_p3 }
   0xf   : > { %2337 = sst [smem:[#allocation19_spill]] %s1965_s30  ;;  %p1406_p7 = scmp.ge.s32.totalorder %s1839_s24, 1 }
  0x10   : > { %s2338_s13 = scalar_select %p1967_p5, 1, 0 }
  0x11   : > { %s2339_s14 = scalar_select %p1971_p6, 1, 0 }
  0x12   : > { %p316_p8 = scmp.lt.s32.totalorder %s1839_s24, 3  ;;  %p2328_p9 = scmp.eq.s32.totalorder %s1950_s25, 0 }
  0x13   : > { %2340 = sst [smem:[#allocation20_spill]] %s2339_s14  ;;  %s1841_s16 = smov [#allocation5]  }
  0x14   : > { %p1978_p10 = pnand %p1406_p7, %p316_p8  ;;  %s343_s17 = sshll.u32 %s1841_s16, 4  ;;  %s344_s17 = int_to_ptr.vmem [resolvable:$true] %s343_s17 }
  0x15   : > { %s1842_s18 = smov [#allocation2]   ;;  %s1843_s26 = smov [#allocation7]  }
  0x16   : > { %s2341_s15 = scalar_select %p1978_p10, 1, 0 }
  0x17   : > { %p1557_p11 = pneg %p1978_p10  ;;  %s332_s19 = sshll.u32 %s1842_s18, 4  ;;  %s1990_s19 = int_to_ptr.vmem [resolvable:$true] %s332_s19 }
  0x18   : > { %s354_s28 = sshll.u32 %s1843_s26, 4  ;;  %s1653_s16 = scalar_lea.hbm %s2314_s3, 16  ;;  %s1992_s28 = int_to_ptr.vmem [resolvable:$true] %s354_s28 }
  0x19   : > { %p1986_p12 = pnand %p2328_p9, %p1557_p11  ;;  %p1654_p13 = scmp.ne.s32.totalorder %s2314_s3, %s1653_s16 }
  0x1a   : > { %p1660_p3 = scmp.lt.u32.totalorder %s1653_s16, %s2314_s3 }
  0x1b   : > { %p2002_p0 = pneg %p1986_p12 }
  0x1d   : > { %p1656_p1 = pnand %p2002_p0, %p1654_p13 }
  0x1f   : > { %p1657_p2 = pneg %p1656_p1 }
  0x21   : > { %p1662_p4 = pnand %p1660_p3, %p1657_p2 }
  0x23   : > { %1665 = shalt.err (!%p1662_p4)
}
  0x24   : > { %s1666_s30 = scalar_lea.vmem %s344_s17, 16  ;;  %s1673_s23 = scalar_lea.vmem %s344_s17, 32 }
  0x25   : > { %p1667_p7 = scmp.ne.s32.totalorder %s344_s17, %s1666_s30  ;;  %p1674_p9 = scmp.lt.s32.totalorder %s344_s17, %s344_s17 }
  0x26   : > { %p1675_p6 = scmp.lt.s32.totalorder %s1673_s23, %s1666_s30 }
  0x27   : > { %p1669_p8 = pnand %p1667_p7, %p2002_p0 }
  0x28   : > { %p1676_p5 = por %p1675_p6, %p1674_p9 }
  0x29   : > { %p1670_p11 = pneg %p1669_p8 }
  0x2b   : > { %p1677_p10 = pnand %p1676_p5, %p1670_p11 }
  0x2d   : > { %1680 = shalt.err (!%p1677_p10)
}
  0x2e   : > { %1563 = dma.hbm_to_vmem [thread:$0]  (!%p1986_p12), %s2314_s3, 16, %s344_s17, [#allocation6]  }
  0x2f   : > { %s1681_s26 = scalar_lea.hbm %s2313_s2, 16 }
  0x30   : > { %p1682_p13 = scmp.ne.s32.totalorder %s2313_s2, %s1681_s26  ;;  %p1688_p5 = scmp.lt.u32.totalorder %s1681_s26, %s2313_s2 }
  0x32   : > { %p1684_p1 = pnand %p1682_p13, %p2002_p0 }
  0x34   : > { %p1685_p6 = pneg %p1684_p1 }
  0x36   : > { %p1690_p9 = pnand %p1688_p5, %p1685_p6 }
  0x38   : > { %1693 = shalt.err (!%p1690_p9)
}
  0x39   : > { %s1694_s17 = scalar_lea.vmem %s1990_s19, 16  ;;  %s1701_s21 = scalar_lea.vmem %s1990_s19, 32 }
  0x3a   : > { %p1695_p10 = scmp.ne.s32.totalorder %s1990_s19, %s1694_s17  ;;  %p1702_p4 = scmp.lt.s32.totalorder %s1990_s19, %s1990_s19 }
  0x3b   : > { %p1703_p7 = scmp.lt.s32.totalorder %s1701_s21, %s1694_s17 }
  0x3c   : > { %p1697_p2 = pnand %p1695_p10, %p2002_p0 }
  0x3d   : > { %p1704_p8 = por %p1703_p7, %p1702_p4 }
  0x3e   : > { %p1698_p3 = pneg %p1697_p2 }
  0x40   : > { %p1705_p11 = pnand %p1704_p8, %p1698_p3 }
  0x42   : > { %1708 = shalt.err (!%p1705_p11)
}
  0x43   : > { %1560 = dma.hbm_to_vmem [thread:$0]  (!%p1986_p12), %s2313_s2, 16, %s1990_s19, [#allocation3]  }
  0x44   : > { %s1709_s16 = scalar_lea.hbm %s2315_s4, 64 }
  0x45   : > { %p1710_p13 = scmp.ne.s32.totalorder %s2315_s4, %s1709_s16  ;;  %p1716_p5 = scmp.lt.u32.totalorder %s1709_s16, %s2315_s4 }
  0x47   : > { %p1712_p1 = pnand %p1710_p13, %p2002_p0 }
  0x49   : > { %p1713_p6 = pneg %p1712_p1 }
  0x4b   : > { %p1718_p9 = pnand %p1716_p5, %p1713_p6 }
  0x4d   : > { %1721 = shalt.err (!%p1718_p9)
}
  0x4e   : > { %s1722_s19 = scalar_lea.vmem %s1992_s28, 64  ;;  %p1730_p4 = scmp.lt.s32.totalorder %s1992_s28, %s1992_s28 }
  0x4f   : > { %p1723_p10 = scmp.ne.s32.totalorder %s1992_s28, %s1722_s19  ;;  %p1731_p7 = scmp.lt.s32.totalorder %s1722_s19, %s1722_s19 }
  0x51   : > { %p1725_p2 = pnand %p1723_p10, %p2002_p0  ;;  %p1732_p8 = por %p1731_p7, %p1730_p4 }
  0x53   : > { %p1726_p3 = pneg %p1725_p2 }
  0x55   : > { %p1733_p11 = pnand %p1732_p8, %p1726_p3 }
  0x57   : > { %1736 = shalt.err (!%p1733_p11)
}
  0x58   : > { %1566 = dma.hbm_to_vmem [thread:$0]  (!%p1986_p12), %s2315_s4, 64, %s1992_s28, [#allocation6]  }
  0x59   : > { %s1844_s27 = smov [#allocation8]   ;;  %s1737_s26 = scalar_lea.hbm %s2316_s5, 2560 }
  0x5a   : > { %s364_s29 = sshll.u32 %s1844_s27, 4  ;;  %p1738_p13 = scmp.ne.s32.totalorder %s2316_s5, %s1737_s26  ;;  %s365_s29 = int_to_ptr.vmem [resolvable:$true] %s364_s29 }
  0x5b   : > { %p1744_p5 = scmp.lt.u32.totalorder %s1737_s26, %s2316_s5 }
  0x5c   : > { %p1740_p1 = pnand %p1738_p13, %p2002_p0 }
  0x5e   : > { %p1741_p6 = pneg %p1740_p1 }
  0x60   : > { %p1746_p9 = pnand %p1744_p5, %p1741_p6 }
  0x62   : > { %1749 = shalt.err (!%p1746_p9)
}
  0x63   : > { %s1750_s28 = scalar_lea.vmem %s365_s29, 2560  ;;  %p1758_p4 = scmp.lt.s32.totalorder %s365_s29, %s365_s29 }
  0x64   : > { %p1751_p10 = scmp.ne.s32.totalorder %s365_s29, %s1750_s28  ;;  %p1759_p7 = scmp.lt.s32.totalorder %s1750_s28, %s1750_s28 }
  0x66   : > { %p1753_p2 = pnand %p1751_p10, %p2002_p0  ;;  %p1760_p8 = por %p1759_p7, %p1758_p4 }
  0x68   : > { %p1754_p3 = pneg %p1753_p2 }
  0x6a   : > { %p1761_p11 = pnand %p1760_p8, %p1754_p3 }
  0x6c   : > { %1764 = shalt.err (!%p1761_p11)
}
  0x6d   : > { %s1845_s21 = smov 512   ;;  %s1846_s24 = smov 32  }
  0x6e   : > { %1569 = dma.hbm_to_vmem [thread:$0]  (!%p1986_p12), %s2316_s5, 2560, %s365_s29, [#allocation9], %s1845_s21, %s1845_s21, %s1846_s24  }
  0x6f   : > { %p2344_p13 = scmp.ne.s32.totalorder %s2341_s15, 0 }
  0x70   : > { %p2345_p1 = scmp.eq.s32.totalorder (!%p2344_p13), %s1950_s25, 0 }
  0x71   : > { %404 = sbr.rel (%p2344_p13) target bundleno = 1861 (0x745), region = 68 }
  0x78   : > { %1810 = dma.done.wait (%p2345_p1), [#allocation3], 16   ;;  %p2346_p0 = pmov %p2345_p1 }
  0x7a   : > { %1812 = vsyncadd (%p2346_p0), [#allocation3], 4294967280  ;;  %p2347_p6 = pmov %p2346_p0 }
  0x7b   : > { %p2348_p5 = pmov %p2346_p0 }
  0x7c   : > { %1814 = dma.done.wait (%p2347_p6), [#allocation6], 80  }
  0x7d   : > { %1816 = vsyncadd (%p2348_p5), [#allocation6], 4294967216  ;;  %p2349_p9 = pmov %p2346_p0 }
  0x7e   : > { %p2350_p12 = pmov %p2346_p0 }
  0x7f   : > { %1818 = dma.done.wait (%p2349_p9), [#allocation9], 2560  }
  0x80   : > { %1820 = vsyncadd (%p2350_p12), [#allocation9], 4294964736  ;;  %p455_p10 = scmp.lt.s32.totalorder %s1950_s25, 1  ;;  %v1847_v0 = vmov 0.0|0.0   ;;  %vm1848_vm0 = vmmov 0   ;;  %v1849_v1 = vmov 0.0  }
  0x81   : > { %1497 = vmatprep.subr.bf16.mxu1 %v1847_v0  ;;  %1454 = vmatprep.mubr.msk.f32.mxu1 %vm1848_vm0, %v1849_v1  ;;  %v459_v2 = vld [vmem:[%s2312_s1] sm:$0xff]  ;;  %v460_v3 = vld [vmem:[%s2312_s1 + $0x8] sm:$0xff]  ;;  %vm462_vm1 = vcmask 130048   ;;  %v564_v6 = vld [vmem:[#allocation8 + $0x8] sm:$0xff]  ;;  %vm583_vm2 = vcmask 326656   ;;  %s1851_s17 = smov 32  }
  0x82   : > { %722 = vmatprep.mubr.f32.mxu0 %v1849_v1  ;;  %s456_s15 = scalar_select %p455_p10, %s1950_s25, 1  ;;  %v1498_v4 = vpack.c.bf16 %v460_v3, %v459_v2  ;;  %v568_v7 = vld [vmem:[#allocation8 + $0x28] sm:$0xff]  ;;  %v566_v8 = vld [vmem:[#allocation8 + $0x18] sm:$0xff]  ;;  %v563_v11 = vld [vmem:[#allocation8] sm:$0xff] }
  0x83   : > { %v1500_v9 = vpack.c.bf16 %v568_v7, %v564_v6  ;;  %v570_v10 = vld [vmem:[#allocation8 + $0x38] sm:$0xff]  ;;  %v567_v12 = vld [vmem:[#allocation8 + $0x20] sm:$0xff]  ;;  %v565_v15 = vld [vmem:[#allocation8 + $0x10] sm:$0xff]  ;;  %s1852_s21 = smov 96   ;;  %s1853_s20 = smov 8  }
  0x84   : > { %s457_s23 = scalar_lea.vmem %s2311_s0, %s456_s15  ;;  %1499 = vmatpush3.bf16.msra.mxu1 %v1498_v4  ;;  %v1508_v13 = vpack.c.bf16 %v570_v10, %v566_v8  ;;  %v1502_v14 = vpack.c.bf16 %v567_v12, %v563_v11  ;;  %v569_v16 = vld [vmem:[#allocation8 + $0x30] sm:$0xff]  ;;  %v572_v18 = vld [vmem:[#allocation8 + $0x48] sm:$0xff]  ;;  %v574_v20 = vld [vmem:[#allocation8 + $0x58] sm:$0xff]  ;;  %v743_v11 = vlaneseq  ;;  %s1855_s18 = smov 24  }
  0x85   : > { %v2112_v5 = vld [vmem:[%s457_s23] sm:$0x1]  ;;  %1501 = vmatprep.subr.bf16.mxu1 %v1500_v9  ;;  %v1510_v17 = vpack.c.bf16 %v569_v16, %v565_v15  ;;  %v576_v19 = vld [vmem:[#allocation8 + $0x68] sm:$0xff]  ;;  %v571_v23 = vld [vmem:[#allocation8 + $0x40] sm:$0xff]  ;;  %v1850_v9 = vmov 1966171168  }
  0x86   : > { %1509 = vmatprep.subr.bf16.mxu0 %v1508_v13  ;;  %v1504_v21 = vpack.c.bf16 %v576_v19, %v572_v18  ;;  %v578_v22 = vld [vmem:[#allocation8 + $0x78] sm:$0xff]  ;;  %v575_v24 = vld [vmem:[#allocation8 + $0x60] sm:$0xff]  ;;  %v573_v27 = vld [vmem:[#allocation8 + $0x50] sm:$0xff]  ;;  %v741_v10 = vunpack.c.l.s4 %v1850_v9  ;;  %v2133_v15 = vshrl.u32 %v743_v11, 7  ;;  %s1856_s29 = smov 16   ;;  %s1857_s16 = smov 64  }
  0x87   : > { %1455 = vmatmul.mubr.msk.f32.vlgmr.msra.gmra.mrb[0].mxu1 %vm462_vm1, %v2112_v5  ;;  %1511 = vmatpush1.bf16.msra.mxu0 %v1510_v17  ;;  %v1512_v25 = vpack.c.bf16 %v578_v22, %v574_v20  ;;  %v1506_v26 = vpack.c.bf16 %v575_v24, %v571_v23  ;;  %v577_v28 = vld [vmem:[#allocation8 + $0x70] sm:$0xff]  ;;  %v580_v30 = vld [vmem:[#allocation8 + $0x88] sm:$0xff]  ;;  %v582_v31 = vld [vmem:[#allocation8 + $0x98] sm:$0xff]  ;;  %s1858_s26 = smov 120   ;;  %s1859_s30 = smov 112  }
  0x88   : > { %651 = vmatprep.mubr.f32.mxu1 %v1849_v1  ;;  %1503 = vmatpush1.bf16.msra.mxu1 %v1502_v14  ;;  %v1514_v29 = vpack.c.bf16 %v577_v28, %v573_v27  ;;  %v579_v32 = vld [vmem:[#allocation8 + $0x80] sm:$0xff]  ;;  %v581_v33 = vld [vmem:[#allocation8 + $0x90] sm:$0xff]  ;;  %v461_v34 = vld [vmem:[#allocation2] sm:$0x1]  ;;  %v742_v14 = vunpack.c.0.s8 %v741_v10  ;;  %v2143_v24 = vsub.s32 0, %v2133_v15  ;;  %s1860_s23 = smov 104  }
  0x89   : > { %1505 = vmatprep.subr.bf16.mxu1 %v1504_v21  ;;  %1513 = vmatprep.subr.bf16.mxu0 %v1512_v25  ;;  %v537_v49 = vld [vmem:[#allocation7 + $0x1] sm:$0x1]  ;;  %v536_v56 = vld [vmem:[#allocation7] sm:$0x1]  ;;  %v538_v57 = vld [vmem:[#allocation7 + $0x2] sm:$0x1] }
  0x8a   : > { %v539_v59 = vld [vmem:[#allocation7 + $0x3] sm:$0x1]  ;;  %v745_v18 = vsub.s32 %v742_v14, %v2133_v15  ;;  %v738_v22 = vld [vmem:[%s2321_s10] sm:$0x1]  ;;  %s1426_s15 = sshll.u32 %s1950_s25, 4  ;;  %p2351_p3 = scmp.ne.s32.totalorder %s2338_s13, 0 }
  0x8b   : > { %1515 = vmatpush1.bf16.msra.mxu0 %v1514_v29  ;;  %v734_v27 = vld [vmem:[%s2320_s9] sm:$0x1]  ;;  %s1863_s25 = smov [#allocation10]  }
  0x8c   : > { %1507 = vmatpush1.bf16.msra.mxu1 %v1506_v26  ;;  %666 = vmatprep.subr.mxu0 %v582_v31 }
  0x8d   : > { %595 = vmatprep.subr.mxu1 %v580_v30 }
  0x8f   : > { %667 = vmatpush1.msra.mxu0 %v581_v33 }
  0x90   : > { %596 = vmatpush1.msra.mxu1 %v579_v32  ;;  %1522 = vmatprep.subr.bf16.mxu0 %v1847_v0 }
  0x91   : > { %1516 = vmatprep.subr.bf16.mxu1 %v1847_v0 }
 0x15a   : > { %v532_v35 = vpop.f32.mrb[0].mxu1 }
 0x15b   : > { %v533_v36 = vadd.f32 %v532_v35, %v461_v34  ;;  %v1456_v37 = vpop.f32.mrb[1].mxu1  ;;  %v2166_v34 = vld [vmem:[%s2319_s8] sm:$0xff] }
 0x15c   : > { %v1854_v37 = vmov 0  }
 0x15d   : > { %v544_v38 = vadd.f32 2.0, %v533_v36  ;;  %v540_v44 = vmul.f32 0.5, %v533_v36  ;;  %v561_v63 = vmul.f32 %v539_v59, %v533_v36 }
 0x15f   : > { %v546_v39 = vand.u32 2147483647, %v544_v38  ;;  %v545_v46 = vmax.f32 %v544_v38, 0.0 }
 0x161   : > { %v547_v40 = vsub.f32 0.0, %v546_v39 }
 0x163   : > { %v548_v41 = vmul.f32 1.442695, %v547_v40 }
 0x165   : > { %1637 = vpow2.f32 %v548_v41 }
 0x16f   : > { %v1638_v42 = vpop.eup %1637 }
 0x170   : > { %v550_v43 = vadd.f32 1.0, %v1638_v42 }
 0x172   : > { %1639 = vlog2.f32 %v550_v43 }
 0x173   : > { %1641 = vtanh.f32 %v540_v44 }
 0x17c   : > { %v1640_v45 = vpop.eup %1639 }
 0x17d   : > { %v552_v47 = vmul.f32 0.6931472, %v1640_v45  ;;  %v1642_v53 = vpop.eup %1641 }
 0x17e   : > { %v542_v54 = vadd.f32 1.0, %v1642_v53 }
 0x17f   : > { %v553_v48 = vadd.f32 %v552_v47, %v545_v46 }
 0x180   : > { %v543_v55 = vmul.f32 0.5, %v542_v54 }
 0x181   : > { %v554_v50 = vadd.f32 1e-06, %v553_v48 }
 0x182   : > { %v558_v60 = vmul.f32 %v543_v55, %v536_v56 }
 0x183   : > { %v555_v51 = vmul.f32 %v554_v50, %v537_v49 }
 0x185   : > { %v556_v52 = vadd.f32 1e-06, %v555_v51 }
 0x187   : > { %1643 = vrsqrt.f32 %v556_v52 }
 0x191   : > { %v1644_v58 = vpop.eup %1643 }
 0x192   : > { %v559_v61 = vmul.f32 %v1644_v58, %v538_v57 }
 0x194   : > { %v560_v62 = vadd.f32 %v559_v61, %v558_v60 }
 0x196   : > { %v562_v2 = vadd.f32 %v561_v63, %v560_v62 }
 0x198   : > { %1418 = vmatmul.mubr.msk.f32.vlgmr.msra.gmra.mrb[2].mxu1 %vm583_vm2, %v562_v2  ;;  %1419 = vmatmul.mubr.msk.f32.vlgmr.msra.gmra.mrb[0].mxu0 %vm583_vm2, %v562_v2 }
 0x199   : > { %1476 = vmatprep.mubr.msk.f32.mxu0 %vm1848_vm0, %v1849_v1  ;;  %1465 = vmatprep.mubr.msk.f32.mxu1 %vm1848_vm0, %v1849_v1 }
 0x26b   : > { %v2123_v3 = vpop.f32.mrb[2].mxu1  ;;  %v2125_v4 = vpop.f32.mrb[0].mxu0 }
 0x26c   : > { %v1537_v6 = vtrunc.f32 %v2123_v3  ;;  %v2128_v7 = vpop.f32.mrb[3].mxu1  ;;  %v2130_v8 = vpop.f32.mrb[1].mxu0 }
 0x26e   : > { %v1538_v12 = vcvt.f32.s32 %v1537_v6 }
 0x270   : > { %v730_v13 = vcvt.s32.f32 %v1538_v12 }
 0x272   : > { %vm731_vm3 = vcmp.gt.f32.partialorder %v2123_v3, %v730_v13 }
 0x273   : > { %v732_v16 = vsel %vm731_vm3, 1.0, %v1849_v1 }
 0x274   : > { %v733_v17 = vadd.f32 %v732_v16, %v730_v13 }
 0x276   : > { %v735_v19 = vsub.f32 %v733_v17, %v730_v13 }
 0x278   : > { %v746_v20 = vrot.slane %v735_v19, %v745_v18  ;;  %v736_v28 = vmul.f32 %v735_v19, %v734_v27  ;;  %v946_v19 = vld [vmem:[%s2317_s6 + $0x8] sm:$0xff] }
 0x27a   : > { %v753_v21 = vrot.slane %v746_v20, %v745_v18  ;;  %v2152_v31 = vadd.f32 %v736_v28, %v730_v13  ;;  %v945_v18 = vld [vmem:[%s2317_s6] sm:$0xff] }
 0x27b   : > { %v1517_v20 = vpack.c.bf16 %v946_v19, %v945_v18  ;;  %v1221_v18 = vld [vmem:[%s2318_s7 + $0x10] sm:$0xff] }
 0x27c   : > { %754 = vrot.lane.b32.xlu0 %v753_v21, %s1851_s17  ;;  %v2158_v33 = vrot.slane %v2152_v31, %v2143_v24  ;;  %v947_v21 = vld [vmem:[%s2317_s6 + $0x10] sm:$0xff] }
 0x27d   : > { %1524 = vmatpush3.bf16.msra.mxu0 %v1517_v20  ;;  %1518 = vmatpush3.bf16.msra.mxu1 %v1517_v20 }
 0x27e   : > { %1525 = vmatprep.subr.bf16.mxu0 %v1847_v0  ;;  %1519 = vmatprep.subr.bf16.mxu1 %v1847_v0 }
 0x2ee   : > { %v755_v23 = vpop.permute.xlu0 %754 }
 0x2ef   : > { %v757_v25 = vmul.f32 %v755_v23, %v738_v22  ;;  %v948_v22 = vld [vmem:[%s2317_s6 + $0x18] sm:$0xff] }
 0x2f0   : > { %v1520_v23 = vpack.c.bf16 %v948_v22, %v947_v21 }
 0x2f1   : > { %v762_v26 = vrot.slane %v757_v25, %v2143_v24 }
 0x2f2   : > { %1527 = vmatpush3.bf16.msra.mxu0 %v1520_v23  ;;  %1521 = vmatpush3.bf16.msra.mxu1 %v1520_v23 }
 0x2f3   : > { %763 = vrot.lane.b32.xlu0 %v762_v26, %s1852_s21  ;;  %1531 = vmatprep.subr.bf16.mxu0 %v1847_v0 }
 0x2f4   : > { %1528 = vmatprep.subr.bf16.mxu1 %v1847_v0 }
 0x365   : > { %v764_v29 = vpop.permute.xlu0 %763 }
 0x366   : > { %v2150_v30 = vadd.f32 %v764_v29, %v730_v13 }
 0x368   : > { %v779_v32 = vrot.slane %v2150_v30, %v2143_v24 }
 0x36a   : > { %861 = vbcast.lane.b32.xlu0 %v779_v32, 376  ;;  %804 = vbcast.lane.b32.xlu1 %v779_v32, 360 }
 0x36e   : > { %833 = vbcast.lane.b32.xlu1 %v779_v32, 368  ;;  %799 = vbcast.lane.b32.xlu0 %v2158_v33, 264 }
 0x372   : > { %856 = vbcast.lane.b32.xlu1 %v2158_v33, 280  ;;  %828 = vbcast.lane.b32.xlu0 %v2158_v33, 272 }
 0x376   : > { %782 = vbcast.lane.b32.xlu1 %v779_v32, 352  ;;  %813 = vrot.lane.b32.xlu0 %v2166_v34, %s1853_s20 }
 0x3dc   : > { %v862_v35 = vpop.permute.xlu0 %861  ;;  %v805_v36 = vpop.permute.xlu1 %804 }
 0x3dd   : > { %vm863_vm4 = vcmp.eq.f32.partialorder %v862_v35, %v779_v32  ;;  %vm806_vm5 = vcmp.eq.f32.partialorder %v805_v36, %v779_v32 }
 0x3de   : > { %v864_v38 = vsel %vm863_vm4, 1, %v1854_v37  ;;  %v807_v39 = vsel %vm806_vm5, 1, %v1854_v37 }
 0x3df   : > { %808 = vrot.lane.b32.xlu1 %v807_v39, %s1851_s17  ;;  %865 = vrot.lane.b32.xlu0 %v864_v38, %s1851_s17 }
 0x3e0   : > { %v834_v40 = vpop.permute.xlu1 %833  ;;  %v800_v45 = vpop.permute.xlu0 %799 }
 0x3e1   : > { %vm835_vm6 = vcmp.eq.f32.partialorder %v834_v40, %v779_v32  ;;  %vm801_vm8 = vcmp.eq.f32.partialorder %v800_v45, %v2158_v33  ;;  %v1861_v45 = vmov 1.0  }
 0x3e2   : > { %v836_v41 = vsel %vm835_vm6, 1, %v1854_v37  ;;  %vm791_vm6 = vcmask 64512  }
 0x3e3   : > { %837 = vrot.lane.b32.xlu1 %v836_v41, %s1851_s17  ;;  %869 = vrot.lane.b32.xlu0 %v2166_v34, %s1855_s18 }
 0x3e4   : > { %v857_v42 = vpop.permute.xlu1 %856  ;;  %v829_v46 = vpop.permute.xlu0 %828 }
 0x3e5   : > { %vm830_vm12 = vcmp.eq.f32.partialorder %v829_v46, %v2158_v33  ;;  %vm858_vm15 = vcmp.eq.f32.partialorder %v857_v42, %v2158_v33 }
 0x3e7   : > { %841 = vrot.lane.b32.xlu1 %v2166_v34, %s1856_s29  ;;  %1036 = vrot.lane.b32.xlu0 %v2128_v7, %s1857_s16 }
 0x3e8   : > { %v783_v43 = vpop.permute.xlu1 %782  ;;  %v814_v47 = vpop.permute.xlu0 %813 }
 0x3e9   : > { %vm784_vm7 = vcmp.eq.f32.partialorder %v783_v43, %v779_v32 }
 0x3ea   : > { %v785_v44 = vsel %vm784_vm7, 1, %v1854_v37 }
 0x3eb   : > { %773 = vbcast.lane.b32.xlu1 %v2158_v33, 256  ;;  %786 = vrot.lane.b32.xlu0 %v785_v44, %s1851_s17 }
 0x3ef   : > { %925 = vrot.lane.b32.xlu1 %v2128_v7, %s1852_s21 }
 0x3f3   : > { %930 = vrot.lane.b32.xlu1 %v2125_v4, %s1851_s17 }
 0x451   : > { %v809_v48 = vpop.permute.xlu1 %808  ;;  %v866_v49 = vpop.permute.xlu0 %865 }
 0x452   : > { %vm810_vm9 = vcmp.ne.s32.totalorder %v809_v48, 0  ;;  %vm867_vm14 = vcmp.ne.s32.totalorder %v866_v49, 0 }
 0x453   : > { %vm811_vm10 = vmand %vm801_vm8, %vm810_vm9 }
 0x454   : > { %v816_v50 = vsel %vm811_vm10, %v814_v47, 0.0  ;;  %vm868_vm2 = vmand %vm858_vm15, %vm867_vm14 }
 0x455   : > { %v838_v51 = vpop.permute.xlu1 %837  ;;  %v870_v52 = vpop.permute.xlu0 %869  ;;  %818 = vrot.lane.b32.xlu1 %v816_v50, %s1858_s26 }
 0x456   : > { %vm839_vm11 = vcmp.ne.s32.totalorder %v838_v51, 0  ;;  %v872_v58 = vsel %vm868_vm2, %v870_v52, 0.0 }
 0x457   : > { %vm840_vm13 = vmand %vm830_vm12, %vm839_vm11  ;;  %vm913_vm11 = vcmask 195584   ;;  %vm949_vm12 = vcmask 261120  }
 0x459   : > { %v842_v53 = vpop.permute.xlu1 %841  ;;  %v1037_v54 = vpop.permute.xlu0 %1036  ;;  %916 = vrot.lane.b32.xlu1 %v2123_v3, %s1852_s21 }
 0x45a   : > { %v844_v55 = vsel %vm840_vm13, %v842_v53, 0.0  ;;  %v1039_v56 = vsub.f32 %v2150_v30, %v1037_v54 }
 0x45b   : > { %846 = vrot.lane.b32.xlu0 %v844_v55, %s1859_s30 }
 0x45c   : > { %v1040_v57 = vmul.f32 %v1039_v56, %v2125_v4 }
 0x45d   : > { %v774_v59 = vpop.permute.xlu1 %773  ;;  %v787_v60 = vpop.permute.xlu0 %786 }
 0x45e   : > { %vm775_vm3 = vcmp.eq.f32.partialorder %v774_v59, %v2158_v33  ;;  %vm788_vm4 = vcmp.ne.s32.totalorder %v787_v60, 0  ;;  %v1042_v14 = vmul.f32 %v1040_v57, %v1040_v57 }
 0x45f   : > { %874 = vrot.lane.b32.xlu0 %v872_v58, %s1860_s23  ;;  %vm789_vm5 = vmand %vm775_vm3, %vm788_vm4  ;;  %s1769_s23 = sshll.u32 %s1863_s25, 4  ;;  %s1770_s23 = int_to_ptr.vmem [resolvable:$false] %s1769_s23 }
 0x460   : > { %v790_v61 = vsel %vm789_vm5, %v2166_v34, 0.0  ;;  %v884_v34 = vand.u32 127, %v743_v11  ;;  %s1771_s19 = scalar_lea.vmem %s1770_s23, 32 }
 0x461   : > { %v792_v62 = vsel %vm791_vm6, %v790_v61, 0.0  ;;  %v926_v63 = vpop.permute.xlu1 %925 }
 0x462   : > { %v928_v13 = vsub.f32 %v2150_v30, %v926_v63  ;;  %v891_v38 = vadd.s32 4294967288, %v884_v34  ;;  %v898_v40 = vadd.s32 4294967280, %v884_v34  ;;  %v905_v43 = vadd.s32 4294967272, %v884_v34 }
 0x463   : > { %1031 = vrot.lane.b32.xlu0 %v2123_v3, %s1857_s16  ;;  %v887_v48 = vsub.s32 %v884_v34, %v2133_v15 }
 0x464   : > { %v901_v46 = vsub.s32 %v898_v40, %v2133_v15  ;;  %v908_v50 = vsub.s32 %v905_v43, %v2133_v15 }
 0x465   : > { %v931_v2 = vpop.permute.xlu1 %930 }
 0x466   : > { %v933_v16 = vmul.f32 %v931_v2, %v928_v13 }
 0x467   : > { %921 = vrot.lane.b32.xlu0 %v2128_v7, %s1851_s17 }
 0x468   : > { %v935_v17 = vmul.f32 %v933_v16, %v933_v16  ;;  %v1220_v16 = vld [vmem:[%s2318_s7 + $0x8] sm:$0xff] }
 0x47d   : > { %793 = vadd.xlane.f32.xlu1 %v792_v62 }
 0x4c7   : > { %v819_v6 = vpop.permute.xlu1 %818 }
 0x4c8   : > { %v821_v3 = vsel %vm791_vm6, %v819_v6, 0.0  ;;  %v1132_v6 = vmul.f32 4.0, %v2152_v31 }
 0x4c9   : > { %822 = vadd.xlane.f32.xlu0 %v821_v3 }
 0x4cb   : > { %v917_v27 = vpop.permute.xlu1 %916 }
 0x4cc   : > { %v919_v37 = vsub.f32 %v2152_v31, %v917_v27 }
 0x4cd   : > { %v847_v9 = vpop.permute.xlu0 %846 }
 0x4ce   : > { %v849_v7 = vsel %vm791_vm6, %v847_v9, 0.0 }
 0x4cf   : > { %850 = vadd.xlane.f32.xlu1 %v849_v7 }
 0x4d1   : > { %v875_v10 = vpop.permute.xlu0 %874 }
 0x4d2   : > { %v877_v12 = vsel %vm791_vm6, %v875_v10, 0.0  ;;  %v1138_v10 = vld [vmem:[%s2322_s11] sm:$0xff] }
 0x4d3   : > { %878 = vadd.xlane.f32.xlu1 %v877_v12 }
 0x4df   : > { %1044 = vrot.lane.b32.xlu0 %v1042_v14, %s1851_s17  ;;  %v1862_v14 = vmov 1.0|1.0  }
 0x4e3   : > { %1134 = vrot.lane.b32.xlu0 %v2150_v30, %s1851_s17 }
 0x4e4   : > { %937 = vrot.lane.b32.xlu1 %v935_v17, %s1851_s17  ;;  %s453_s17 = sand.u32 1, %s1831_s22  }
 0x4e5   : > { %s454_s20 = scalar_lea.vmem [#allocation10], %s453_s17  ;;  %s1300_s26 = scalar_lea.sflag [#allocation4], %s453_s17 }
 0x4e7   : > { %1127 = vrot.lane.b32.xlu0 %v2130_v8, %s1857_s16  ;;  %s2269_s16 = scalar_lea.hbm %s2323_s12, %s1426_s15 }
 0x4e8   : > { %1026 = vrot.lane.b32.xlu1 %v2130_v8, %s1852_s21  ;;  %v1032_v8 = vpop.permute.xlu0 %1031  ;;  %s1312_s21 = sshll.u32 %s454_s20, 4  ;;  %s2271_s21 = int_to_ptr.vmem [resolvable:$true] %s1312_s21 }
 0x4e9   : > { %v1034_v25 = vsub.f32 %v2152_v31, %v1032_v8  ;;  %v1139_v31 = vld [vmem:[%s2322_s11 + $0x8] sm:$0xff]  ;;  %s1765_s30 = scalar_lea.vmem %s2271_s21, 16  ;;  %p1772_p8 = scmp.lt.s32.totalorder %s2271_s21, %s1770_s23 }
 0x4ea   : > { %p1766_p2 = scmp.ne.s32.totalorder %s2271_s21, %s1765_s30  ;;  %p1773_p11 = scmp.lt.s32.totalorder %s1771_s19, %s1765_s30 }
 0x4eb   : > { %v1035_v28 = vmul.f32 %v1034_v25, %v2125_v4  ;;  %v894_v4 = vsub.s32 %v891_v38, %v2133_v15 }
 0x4ec   : > { %v922_v26 = vpop.permute.xlu0 %921  ;;  %p1767_p4 = pnand %p1766_p2, %p2351_p3  ;;  %p1774_p13 = por %p1773_p11, %p1772_p8 }
 0x4ed   : > { %v1041_v32 = vmul.f32 %v1035_v28, %v1035_v28  ;;  %v924_v41 = vmul.f32 %v922_v26, %v919_v37  ;;  %v1223_v37 = vld [vmem:[#allocation5] sm:$0x1] }
 0x4ee   : > { %p1768_p7 = pneg %p1767_p4 }
 0x4ef   : > { %v934_v47 = vmul.f32 %v924_v41, %v924_v41 }
 0x4f0   : > { %p1775_p1 = pnand %p1774_p13, %p1768_p7 }
 0x50a   : > { %v794_v30 = vpop.xlane.xlu1 %793 }
 0x50b   : > { %vm795_vm9 = vcmp.gt.f32.partialorder %v794_v30, 0.5 }
 0x50c   : > { %v796_v51 = vsel %vm795_vm9, 0.0, %v1861_v45 }
 0x50d   : > { %v888_v57 = vrot.slane %v796_v51, %v887_v48 }
 0x556   : > { %v823_v29 = vpop.xlane.xlu0 %822 }
 0x557   : > { %vm824_vm7 = vcmp.gt.f32.partialorder %v823_v29, 0.5 }
 0x558   : > { %v825_v11 = vsel %vm824_vm7, 0.0, %v1861_v45 }
 0x559   : > { %v895_v54 = vrot.slane %v825_v11, %v894_v4 }
 0x55a   : > { %v1045_v33 = vpop.permute.xlu0 %1044 }
 0x55b   : > { %v1047_v35 = vadd.f32 %v1045_v33, %v1041_v32  ;;  %v911_v60 = vsel %vm791_vm6, %v888_v57, %v895_v54 }
 0x55c   : > { %v851_v36 = vpop.xlane.xlu1 %850 }
 0x55d   : > { %v1048_v39 = vmul.f32 -0.5, %v1047_v35  ;;  %vm852_vm8 = vcmp.gt.f32.partialorder %v851_v36, 0.5 }
 0x55e   : > { %v853_v49 = vsel %vm852_vm8, 0.0, %v1861_v45  ;;  %v1135_v63 = vpop.permute.xlu0 %1134 }
 0x55f   : > { %v1049_v42 = vmul.f32 1.442695, %v1048_v39  ;;  %v902_v56 = vrot.slane %v853_v49, %v901_v46  ;;  %v1137_v9 = vadd.f32 %v1135_v63, %v1132_v6 }
 0x560   : > { %v879_v44 = vpop.xlane.xlu1 %878 }
 0x561   : > { %1645 = vpow2.f32 %v1049_v42  ;;  %vm880_vm10 = vcmp.gt.f32.partialorder %v879_v44, 0.5  ;;  %v912_v62 = vsel %vm462_vm1, %v911_v60, %v902_v56  ;;  %v1143_v7 = vrot.slane %v1137_v9, %v2143_v24  ;;  %v1219_v24 = vld [vmem:[%s2318_s7] sm:$0xff] }
 0x562   : > { %v881_v52 = vsel %vm880_vm10, 0.0, %v1861_v45  ;;  %v1532_v17 = vpack.c.bf16 %v1220_v16, %v1219_v24  ;;  %v1128_v30 = vpop.permute.xlu0 %1127 }
 0x563   : > { %v909_v58 = vrot.slane %v881_v52, %v908_v50  ;;  %vm1144_vm13 = vcmp.eq.f32.partialorder %v1138_v10, %v1143_v7  ;;  %vm1145_vm14 = vcmp.eq.f32.partialorder %v1139_v31, %v1143_v7 }
 0x564   : > { %v938_v53 = vpop.permute.xlu1 %937  ;;  %vm1529_vm15 = vmpackc.low %vm1145_vm14, %vm1144_vm13 }
 0x565   : > { %v940_v55 = vadd.f32 %v938_v53, %v934_v47  ;;  %v914_v15 = vsel %vm913_vm11, %v912_v62, %v909_v58 }
 0x567   : > { %v941_v59 = vmul.f32 -0.5, %v940_v55 }
 0x568   : > { %v1027_v32 = vpop.permute.xlu1 %1026 }
 0x569   : > { %v942_v61 = vmul.f32 1.442695, %v941_v59 }
 0x56b   : > { %v1646_v2 = vpop.eup %1645  ;;  %1647 = vpow2.f32 %v942_v61 }
 0x56c   : > { %v1051_v3 = vmul.f32 %v1646_v2, %v914_v15 }
 0x56e   : > { %1477 = vmatmul.mubr.msk.f32.vlgmr.msra.gmra.mrb[2].mxu0 %vm949_vm12, %v1051_v3 }
 0x56f   : > { %1494 = vmatprep.mubr.msk.f32.mxu0 %vm1848_vm0, %v1849_v1  ;;  %1533 = vmatpush3.bf16.msra.mxu0 %v1532_v17 }
 0x570   : > { %1534 = vmatprep.subr.bf16.mxu0 %v1847_v0 }
 0x575   : > { %v1648_v12 = vpop.eup %1647 }
 0x576   : > { %v944_v13 = vmul.f32 %v1648_v12, %v914_v15 }
 0x578   : > { %1466 = vmatmul.mubr.msk.f32.vlgmr.msra.gmra.mrb[4].mxu1 %vm949_vm12, %v944_v13 }
 0x579   : > { %1530 = vmatpush3.bf16.msk.msra.mxu1 %vm1529_vm15, %v1862_v14  ;;  %1483 = vmatprep.mubr.msk.f32.mxu1 %vm1848_vm0, %v1849_v1  ;;  %v1222_v1 = vld [vmem:[%s2318_s7 + $0x18] sm:$0xff]  ;;  %vm1297_vm0 = vcmask 57344  }
 0x57c   : > { %1484 = vmatmul.mubr.msk.f32.vlgmr.msra.gmra.mrb[6].mxu1 %vm462_vm1, %v2112_v5  ;;  %v1535_v5 = vpack.c.bf16 %v1222_v1, %v1221_v18 }
 0x57e   : > { %1536 = vmatpush3.bf16.msra.mxu0 %v1535_v5 }
 0x641   : > { %v1121_v19 = vpop.f32.mrb[2].mxu0 }
 0x642   : > { %v1478_v20 = vpop.f32.mrb[3].mxu0  ;;  %v1122_v21 = vadd.f32 1e-06, %v1121_v19 }
 0x644   : > { %1649 = vrcp.f32 %v1122_v21 }
 0x64b   : > { %v1019_v22 = vpop.f32.mrb[4].mxu1 }
 0x64c   : > { %v1020_v23 = vadd.f32 1e-06, %v1019_v22  ;;  %v1467_v8 = vpop.f32.mrb[5].mxu1 }
 0x64e   : > { %1651 = vrcp.f32 %v1020_v23  ;;  %v1650_v26 = vpop.eup %1649 }
 0x64f   : > { %v1214_v0 = vpop.f32.mrb[6].mxu1  ;;  %v1126_v27 = vmul.f32 %v1650_v26, %v1051_v3 }
 0x650   : > { %v1485_v25 = vpop.f32.mrb[7].mxu1 }
 0x651   : > { %v1130_v34 = vmul.f32 %v1128_v30, %v1126_v27 }
 0x658   : > { %v1652_v28 = vpop.eup %1651 }
 0x659   : > { %v1024_v29 = vmul.f32 %v1652_v28, %v944_v13 }
 0x65b   : > { %v1029_v33 = vmul.f32 %v1027_v32, %v1024_v29 }
 0x65d   : > { %v1131_v35 = vadd.f32 %v1130_v34, %v1029_v33 }
 0x65f   : > { %v1218_v36 = vmul.f32 %v1214_v0, %v1131_v35 }
 0x661   : > { %1495 = vmatmul.mubr.msk.f32.vlgmr.msra.gmra.mrb[4].mxu0 %vm949_vm12, %v1218_v36 }
 0x734   : > { %v1293_v38 = vpop.f32.mrb[4].mxu0 }
 0x735   : > { %v1294_v39 = vadd.f32 %v1293_v38, %v1223_v37  ;;  %v1496_v40 = vpop.f32.mrb[5].mxu0 }
 0x737   : > { %1298 = vst.msk [vmem:[%s454_s20] sm:$0x1] %vm1297_vm0, %v1294_v39 }
 0x738   : > { %1778 = shalt.err (!%p1775_p1)
}
 0x739   : > { %s1779_s28 = scalar_lea.hbm %s2269_s16, 16  ;;  %s1783_s14 = scalar_lea.hbm %s2323_s12, 32 }
 0x73a   : > { %p1780_p0 = scmp.ne.s32.totalorder %s2269_s16, %s1779_s28  ;;  %p1784_p9 = scmp.lt.u32.totalorder %s2269_s16, %s2323_s12 }
 0x73b   : > { %p1785_p12 = scmp.lt.u32.totalorder %s1783_s14, %s1779_s28  ;;  %p1787_p2 = scmp.lt.u32.totalorder %s1779_s28, %s2269_s16 }
 0x73c   : > { %p1781_p6 = pnand %p1780_p0, %p2351_p3 }
 0x73d   : > { %p1786_p10 = por %p1785_p12, %p1784_p9 }
 0x73e   : > { %p1782_p5 = pneg %p1781_p6 }
 0x73f   : > { %p1788_p4 = por %p1787_p2, %p1786_p10 }
 0x741   : > { %p1789_p7 = pnand %p1788_p4, %p1782_p5 }
 0x743   : > { %1792 = shalt.err (!%p1789_p7)
}
 0x744   : > { %1555 = dma.vmem_to_hbm [thread:$0]  (%p2351_p3), %s2271_s21, 16, %s2269_s16, %s1300_s26  }
 0x745 PF: > { %s2352_s20 = sld [smem:[#allocation17_spill]]  ;;  %s2353_s18 = sld [smem:[#allocation15_spill]] }
 0x746   : > { %s2354_s29 = sld [smem:[#allocation20_spill]] }
 0x74b   : > { %p1582_p8 = scmp.ge.s32.totalorder %s2352_s20, 2  ;;  %s1324_s30 = sand.u32 1, %s2353_s18  }
 0x74c   : > { %p2355_p11 = scmp.ne.s32.totalorder %s2354_s29, 0  ;;  %s1325_s25 = scalar_lea.sflag [#allocation4], %s1324_s30 }
 0x74e   : > { %p1571_p13 = pnand %p1582_p8, %p2355_p11 }
 0x750   : > { %1822 = dma.done.wait (!%p1571_p13), %s1325_s25, 16  }
 0x751   : > { %1824 = vsyncadd (!%p1571_p13), %s1325_s25, 4294967280  ;;  %s2356_s24 = sld [smem:[#allocation18_spill]]  ;;  %s2357_s23 = sld [smem:[#allocation16_spill]] }
 0x752   : > { %s2358_s19 = sld [smem:[#allocation19_spill]]  ;;  %s2359_s21 = smov %s1831_s22 }
 0x757   : > { %p25_p1 = scmp.ge.s32.totalorder %s2356_s24, 4   ;;  %s2360_s22 = smov %s2357_s23 }
 0x758   : > { %s2361_s23 = smov %s2358_s19 }
 0x759   :  { %27 = sbr.rel (!%p25_p1) target bundleno = 6 (0x6), region = 120 }
 0x760   :  { %1329 = vsyncpa [#allocation3], 1 }
 0x761   :  { %1331 = vsyncpa [#allocation3 + $0x1], 1 }
 0x762   :  { %1332 = vsyncpa [#allocation6], 1 }
 0x763   :  { %1333 = vsyncpa [#allocation9], 1 }
 0x764   :  { %1334 = vsyncpa [#allocation4], 1 }
 0x765   :  { %1336 = vsyncpa [#allocation4 + $0x1], 1 }

</bundles_post_ra>
